<compile_context>
chip_gen: v6e
topology: v6e:2x2x1
jax: 0.10.0
libtpu: 0.0.40
codegen_flags: <defaults>
</compile_context>

<pallas_src>
import functools
import itertools

import numpy as np
import jax
import jax.numpy as jnp
from jax import lax
from jax.experimental import pallas as pl
from jax.experimental.pallas import tpu as pltpu

IMAGE_SIZE = 640.0
NB_LAYERS = 3
NB_ANCHOR_PER_LAYER = 3
K = NB_LAYERS * NB_ANCHOR_PER_LAYER   # 9 anchors total, as in yolov5 configs
LANES = 128
SUBLANES = 8
ROW_TILE_MAX = 512                    # 512x128 f32 = 256 KiB per plane per tile
NUM_VARIANTS = 32                     # TODO(synk): reference uses 200; demo scale


def _round_up(x, m):
    return ((x + m - 1) // m) * m


def _pop_bucket(p):
    b = 4
    while b < p:
        b *= 2
    return b


def _pick_compute_dtype():
    """bf16 VALU exists on v6e/v7x; keep f32 on v5e and older / unknown parts."""
    try:
        kind = jax.devices()[0].device_kind.lower()
    except Exception:
        return jnp.float32
    if any(tag in kind for tag in ("v6", "v7", "trillium", "ironwood")):
        return jnp.bfloat16
    return jnp.float32


# ----------------------------------------------------------------------------
# lane-dense box layout helpers
# ----------------------------------------------------------------------------
def _prep_boxes(boxes_np):
    """(N, 2) host boxes -> lane-dense (R, 128) planes, R a multiple of the row tile.

    Padding boxes are (w, h) = (0, 0) with valid = 0:
      * fitness kernel  : inter = 0, union = anchor_area > 0 -> IoU = 0 (no mask)
      * k-means stats   : excluded through the `valid` plane
      * ratio assignment: distance = +inf; host slices [:n] before thresholding
    """
    n = int(boxes_np.shape[0])
    r = max(SUBLANES, _round_up((n + LANES - 1) // LANES, SUBLANES))
    tr = min(r, ROW_TILE_MAX)
    r = _round_up(r, tr)
    n_pad = r * LANES
    bw = np.zeros((n_pad,), np.float32)
    bh = np.zeros((n_pad,), np.float32)
    valid = np.zeros((n_pad,), np.float32)
    bw[:n] = boxes_np[:, 0]
    bh[:n] = boxes_np[:, 1]
    valid[:n] = 1.0
    return (jnp.asarray(bw.reshape(r, LANES)),
            jnp.asarray(bh.reshape(r, LANES)),
            jnp.asarray(valid.reshape(r, LANES)),
            n)


# ----------------------------------------------------------------------------
# Kernel 1: ratio-distance nearest-anchor assignment (runs once, row-tiled)
#   anchors flat (2K,) in SMEM, boxes lane-dense (TR,128) tiles.
# ----------------------------------------------------------------------------
def _ratio_assign_kernel(anch_ref, bw_ref, bh_ref, mind_ref, amin_ref, *, k):
    bw = bw_ref[...]                          # (TR, 128)
    bh = bh_ref[...]
    inv_bw = 1.0 / bw                         # computed once, reused for all K
    inv_bh = 1.0 / bh
    min_d = jnp.full(bw.shape, jnp.inf, dtype=jnp.float32)
    amin = jnp.zeros(bw.shape, dtype=jnp.int32)
    for c in range(k):                        # K=9, fully unrolled VPU selects
        aw = anch_ref[c]
        ah = anch_ref[k + c]
        rw = jnp.maximum(bw * (1.0 / aw), aw * inv_bw)
        rh = jnp.maximum(bh * (1.0 / ah), ah * inv_bh)
        d = rw * rh
        better = d < min_d                    # strict < keeps earliest index
        min_d = jnp.where(better, d, min_d)
        amin = jnp.where(better, c, amin)
    mind_ref[...] = min_d                     # lane-dense unmasked stores
    amin_ref[...] = amin


@jax.jit
def ratio_assign(anchors_flat, bw2d, bh2d):
    r, l = bw2d.shape
    tr = min(r, ROW_TILE_MAX)
    n_tiles = r // tr
    return pl.pallas_call(
        functools.partial(_ratio_assign_kernel, k=K),
        grid=(n_tiles,),
        in_specs=[
            pl.BlockSpec(memory_space=pltpu.MemorySpace.SMEM),   # anchors (2K,)
            pl.BlockSpec((tr, l), lambda i: (i, 0)),
            pl.BlockSpec((tr, l), lambda i: (i, 0)),
        ],
        out_specs=[
            pl.BlockSpec((tr, l), lambda i: (i, 0)),
            pl.BlockSpec((tr, l), lambda i: (i, 0)),
        ],
        out_shape=[
            jax.ShapeDtypeStruct((r, l), jnp.float32),
            jax.ShapeDtypeStruct((r, l), jnp.int32),
        ],
        compiler_params=pltpu.CompilerParams(dimension_semantics=("parallel",)),
    )(anchors_flat, bw2d, bh2d)


# ----------------------------------------------------------------------------
# Kernel 2: fused k-means Lloyd statistics (assignment + per-cluster sums)
#   Output: (8,128) accumulator; row 0 = count, row 1 = sum(w), row 2 = sum(h),
#   lanes 0..K-1 used.  No per-box writeback, no XLA one-hot reduction.
# ----------------------------------------------------------------------------
def _kmeans_stats_kernel(anch_ref, bw_ref, bh_ref, valid_ref, stats_ref, *, k):
    i = pl.program_id(0)

    @pl.when(i == 0)
    def _init():
        stats_ref[...] = jnp.zeros_like(stats_ref)

    bw = bw_ref[...]                          # (TR, 128)
    bh = bh_ref[...]
    valid = valid_ref[...]

    # nearest anchor under squared-euclidean (running argmin, ties -> lowest c)
    min_d = jnp.full(bw.shape, jnp.inf, dtype=jnp.float32)
    amin = jnp.zeros(bw.shape, dtype=jnp.int32)
    for c in range(k):
        dw = bw - anch_ref[c]
        dh = bh - anch_ref[k + c]
        d = dw * dw + dh * dh
        better = d < min_d
        min_d = jnp.where(better, d, min_d)
        amin = jnp.where(better, c, amin)

    # per-cluster count / sum(w) / sum(h); XLU reductions ride next to the
    # VALU-bound compare/select chain above, scattered into a tiny (8,128) block.
    sub_idx = lax.broadcasted_iota(jnp.int32, stats_ref.shape, 0)
    lane_idx = lax.broadcasted_iota(jnp.int32, stats_ref.shape, 1)
    tile_stats = jnp.zeros(stats_ref.shape, jnp.float32)
    for c in range(k):
        m = jnp.where(amin == c, valid, 0.0)
        cnt = jnp.sum(m)
        sw = jnp.sum(m * bw)
        sh = jnp.sum(m * bh)
        in_lane = lane_idx == c
        tile_stats = tile_stats + jnp.where(
            (sub_idx == 0) & in_lane, cnt,
            jnp.where((sub_idx == 1) & in_lane, sw,
                      jnp.where((sub_idx == 2) & in_lane, sh, 0.0)))
    stats_ref[...] += tile_stats


@jax.jit
def _kmeans_stats(anchors_flat, bw2d, bh2d, valid2d):
    r, l = bw2d.shape
    tr = min(r, ROW_TILE_MAX)
    n_tiles = r // tr
    return pl.pallas_call(
        functools.partial(_kmeans_stats_kernel, k=K),
        grid=(n_tiles,),
        in_specs=[
            pl.BlockSpec(memory_space=pltpu.MemorySpace.SMEM),   # anchors (2K,)
            pl.BlockSpec((tr, l), lambda i: (i, 0)),
            pl.BlockSpec((tr, l), lambda i: (i, 0)),
            pl.BlockSpec((tr, l), lambda i: (i, 0)),
        ],
        out_specs=pl.BlockSpec((SUBLANES, LANES), lambda i: (0, 0)),   # accumulator
        out_shape=jax.ShapeDtypeStruct((SUBLANES, LANES), jnp.float32),
        compiler_params=pltpu.CompilerParams(dimension_semantics=("arbitrary",)),
    )(anchors_flat, bw2d, bh2d, valid2d)


@functools.partial(jax.jit, static_argnames=("iters",))
def _kmeans_device(bw2d, bh2d, valid2d, init_centers_flat, *, iters):
    def body(_, centers_flat):                # (2K,) = [w..., h...]
        stats = _kmeans_stats(centers_flat, bw2d, bh2d, valid2d)
        cnt = stats[0, :K]
        sw = stats[1, :K]
        sh = stats[2, :K]
        safe = jnp.maximum(cnt, 1.0)
        new_w = jnp.where(cnt > 0, sw / safe, centers_flat[:K])
        new_h = jnp.where(cnt > 0, sh / safe, centers_flat[K:])
        return jnp.concatenate([new_w, new_h])
    return lax.fori_loop(0, iters, body, init_centers_flat)


def kmeans_fit(boxes_np, bw2d, bh2d, valid2d, iters=15):
    # TODO(synk): sklearn KMeans (kmeans++ init, n_init=10) is not reproduced;
    # deterministic area-spread init + on-device Lloyd iterations instead.
    n = boxes_np.shape[0]
    order = np.argsort(boxes_np[:, 0] * boxes_np[:, 1])
    init_idx = order[np.linspace(0, n - 1, K).astype(np.int64)]
    init = boxes_np[init_idx].astype(np.float32)                 # (K, 2)
    init_flat = np.concatenate([init[:, 0], init[:, 1]]).astype(np.float32)
    centers_flat = np.asarray(
        _kmeans_device(bw2d, bh2d, valid2d, jnp.asarray(init_flat), iters=iters))
    return np.stack([centers_flat[:K], centers_flat[K:]], axis=1)  # (K, 2)


# ----------------------------------------------------------------------------
# Kernel 3: batched GA fitness.  grid = (population half ["parallel"],
#   box-row tile ["arbitrary"]).  Population table is a flat SMEM array;
#   per-individual best-IoU sums accumulate into one lane-dense (8,128) block
#   per half; the inner IoU loop runs in bf16 on v6e/v7x, f32 elsewhere; the
#   division uses the EUP approx reciprocal in f32.
# ----------------------------------------------------------------------------
def _fitness_kernel(pop_ref, bw_ref, bh_ref, out_ref, *, k, p_half, compute_dtype):
    i = pl.program_id(0)                      # population half (one per core)
    j = pl.program_id(1)                      # box row tile (reduction axis)

    @pl.when(j == 0)
    def _init():
        out_ref[...] = jnp.zeros_like(out_ref)

    bw = bw_ref[...].astype(compute_dtype)    # (TR, 128)
    bh = bh_ref[...].astype(compute_dtype)
    area_b = bw * bh

    sub_idx = lax.broadcasted_iota(jnp.int32, out_ref.shape, 0)
    lane_idx = lax.broadcasted_iota(jnp.int32, out_ref.shape, 1)
    contrib = jnp.zeros(out_ref.shape, jnp.float32)
    two_k = 2 * k
    for p in range(p_half):                   # this core's slice of the population
        pid = i * p_half + p
        base = pid * two_k
        best = jnp.zeros(bw.shape, jnp.float32)
        for c in range(k):
            aw = pop_ref[base + c].astype(compute_dtype)
            ah = pop_ref[base + k + c].astype(compute_dtype)
            inter = jnp.minimum(bw, aw) * jnp.minimum(bh, ah)
            union = area_b + aw * ah - inter
            iou = inter.astype(jnp.float32) * pl.reciprocal(
                union.astype(jnp.float32), approx=True)
            best = jnp.maximum(best, iou)
        s_p = jnp.sum(best)                   # padded boxes contribute exactly 0
        contrib = contrib + jnp.where((sub_idx == 0) & (lane_idx == p), s_p, 0.0)
    out_ref[...] += contrib                   # full-width unmasked accumulate


@functools.partial(jax.jit, static_argnames=("compute_dtype",))
def _batched_fitness(pop_flat, bw2d, bh2d, *, compute_dtype):
    r, l = bw2d.shape
    tr = min(r, ROW_TILE_MAX)
    n_tiles = r // tr
    p_pad = pop_flat.shape[0] // (2 * K)
    p_half = p_pad // 2
    assert p_half <= LANES, "population bucket exceeds lane capacity"
    kern = functools.partial(_fitness_kernel, k=K, p_half=p_half,
                             compute_dtype=compute_dtype)
    return pl.pallas_call(
        kern,
        grid=(2, n_tiles),
        in_specs=[
            pl.BlockSpec(memory_space=pltpu.MemorySpace.SMEM),   # (P_pad*2K,)
            pl.BlockSpec((tr, l), lambda i, j: (j, 0)),
            pl.BlockSpec((tr, l), lambda i, j: (j, 0)),
        ],
        out_specs=pl.BlockSpec((SUBLANES, LANES), lambda i, j: (i, 0)),
        out_shape=jax.ShapeDtypeStruct((2 * SUBLANES, LANES), jnp.float32),
        compiler_params=pltpu.CompilerParams(
            dimension_semantics=("parallel", "arbitrary")),
    )(pop_flat, bw2d, bh2d)


def _mean_best_iou_batch(pop_list, bw2d, bh2d, n_boxes, p_pad, compute_dtype):
    """List of (K,2) anchor sets -> (P,) mean best wh-IoU per individual."""
    p = len(pop_list)
    assert 0 < p <= p_pad
    arr = np.stack([np.asarray(ind, dtype=np.float32) for ind in pop_list])
    if p < p_pad:
        arr = np.concatenate([arr, np.repeat(arr[:1], p_pad - p, axis=0)], 0)
    # flat layout: [ind0: w0..w8, h0..h8, ind1: ...]  (1-D SMEM, no row padding)
    flat = np.concatenate([arr[:, :, 0], arr[:, :, 1]], axis=1).reshape(-1)
    out = np.asarray(_batched_fitness(jnp.asarray(flat), bw2d, bh2d,
                                      compute_dtype=compute_dtype))
    p_half = p_pad // 2
    sums = np.concatenate([out[0, :p_half], out[SUBLANES, :p_half]])[:p]
    return sums / np.float32(n_boxes)


# ----------------------------------------------------------------------------
# Host-side glue reproducing the forward-pass logic
# ----------------------------------------------------------------------------
def optimize_anchors_forward(boxes_np, seed=0):
    compute_dtype = _pick_compute_dtype()
    bw2d, bh2d, valid2d, n = _prep_boxes(boxes_np)

    # 1) k-means anchor centers (fused assignment+stats kernel, device Lloyd loop)
    centers_anchors = kmeans_fit(boxes_np, bw2d, bh2d, valid2d)     # (K, 2)
    centers_flat = jnp.asarray(np.concatenate(
        [centers_anchors[:, 0], centers_anchors[:, 1]]).astype(np.float32))

    # 2) ratio-distance assignment (keep indices with min distance < 4.0)
    mind2d, amin2d = ratio_assign(centers_flat, bw2d, bh2d)
    min_dist = np.asarray(mind2d).reshape(-1)[:n]
    nearest = np.asarray(amin2d).reshape(-1)[:n]
    assignements_nearest_id = [int(i) for i, d in zip(nearest, min_dist) if d < 4.0]

    # 3) genetic algorithm (same structure as reference)
    rng = np.random.RandomState(seed)
    num_variants = NUM_VARIANTS
    generations = 10
    p_pad = _pop_bucket(num_variants)   # one fixed bucket -> one fitness compile

    populations = [
        centers_anchors * rng.uniform(0.9, 1.1, centers_anchors.shape)
        for _ in range(num_variants)
    ]

    def fitness_batch(pop_list, noise_level=0.01):
        mean_iou = _mean_best_iou_batch(pop_list, bw2d, bh2d, n, p_pad,
                                        compute_dtype)
        noise = rng.uniform(-noise_level, noise_level, len(pop_list))
        return mean_iou * (1.0 + noise)

    # TODO(synk): per-generation host round trips remain -- the GA's selection /
    # crossover bookkeeping is inherently data-dependent host logic.
    for _ in range(generations):
        fitness_scores = fitness_batch(populations, 0.01)
        indices_trie = np.argsort(-fitness_scores)
        num_parents = max(2, int(0.1 * len(populations)))
        selected_parents = [populations[i] for i in indices_trie[:num_parents]]
        children = []
        for parent1, parent2 in itertools.combinations(selected_parents, 2):
            child = (parent1 + parent2) / 2 + rng.normal(0, 0.05, parent1.shape)
            children.append(child)
        fitness_children = fitness_batch(children)
        sorted_children = np.argsort(-fitness_children)
        top_n_child = max(1, int(0.1 * len(children)))
        best_children = [children[i] for i in sorted_children[:top_n_child]]
        populations = best_children + selected_parents

    final_scores = fitness_batch(populations)
    best_final_index = int(np.argmax(final_scores))
    best_final_anchors = populations[best_final_index]

    return {
        "best_children": best_final_anchors,
        "initial_anchors_centers": centers_anchors,
        "assignement_nearest_id": assignements_nearest_id,
    }


# ----------------------------------------------------------------------------
# Reference checks (pure numpy) for the Pallas kernels
# ----------------------------------------------------------------------------
def _ref_mean_best_iou(boxes_np, anchors_np):
    bw = boxes_np[:, 0:1].astype(np.float64)
    bh = boxes_np[:, 1:2].astype(np.float64)
    aw = anchors_np[:, 0][None, :].astype(np.float64)
    ah = anchors_np[:, 1][None, :].astype(np.float64)
    inter = np.minimum(bw, aw) * np.minimum(bh, ah)
    union = bw * bh + aw * ah - inter
    return float(np.mean(np.max(inter / union, axis=1)))


def _ref_ratio_assign(boxes_np, anchors_np):
    bw = boxes_np[:, 0:1].astype(np.float64)
    bh = boxes_np[:, 1:2].astype(np.float64)
    aw = anchors_np[:, 0][None, :].astype(np.float64)
    ah = anchors_np[:, 1][None, :].astype(np.float64)
    dist = np.maximum(bw / aw, aw / bw) * np.maximum(bh / ah, ah / bh)
    return dist.min(axis=1), dist.argmin(axis=1), dist


def _ref_lloyd_stats(boxes_np, centers_np):
    bw = boxes_np[:, 0].astype(np.float32)
    bh = boxes_np[:, 1].astype(np.float32)
    cw = centers_np[:, 0].astype(np.float32)
    ch = centers_np[:, 1].astype(np.float32)
    dw = bw[:, None] - cw[None, :]
    dh = bh[:, None] - ch[None, :]
    d = dw * dw + dh * dh                       # same f32 ops as the kernel
    assign = d.argmin(axis=1)
    cnt = np.bincount(assign, minlength=K).astype(np.float64)
    sw = np.bincount(assign, weights=bw, minlength=K)
    sh = np.bincount(assign, weights=bh, minlength=K)
    return cnt, sw, sh


if __name__ == "__main__":
    # TODO(synk): annotation-file / image-directory / yaml IO of the original
    # module is replaced by synthetic normalized (w, h) boxes * image_size.
    key = jax.random.PRNGKey(0)
    n_boxes = 256
    wh_norm = jax.random.uniform(key, (n_boxes, 2), minval=0.02, maxval=0.5)
    boxes_np = np.asarray(wh_norm, dtype=np.float32) * np.float32(IMAGE_SIZE)

    result = optimize_anchors_forward(boxes_np)
    jax.block_until_ready(jnp.asarray(result["best_children"]))

    compute_dtype = _pick_compute_dtype()
    centers = np.asarray(result["initial_anchors_centers"], dtype=np.float32)
    bw2d, bh2d, valid2d, n = _prep_boxes(boxes_np)
    p_pad = _pop_bucket(NUM_VARIANTS)

    # --- fitness kernel check (approx recip + optional bf16 -> dtype-dep tol) ---
    got = float(_mean_best_iou_batch([centers], bw2d, bh2d, n, p_pad,
                                     compute_dtype)[0])
    want = _ref_mean_best_iou(boxes_np, centers)
    tol = 2e-3 if compute_dtype == jnp.float32 else 1.5e-2
    assert abs(got - want) < tol, (got, want, tol)

    # --- fused k-means statistics kernel check ---
    anch_flat = jnp.asarray(
        np.concatenate([centers[:, 0], centers[:, 1]]).astype(np.float32))
    stats = np.asarray(_kmeans_stats(anch_flat, bw2d, bh2d, valid2d))
    ref_cnt, ref_sw, ref_sh = _ref_lloyd_stats(boxes_np, centers)
    assert np.allclose(stats[0, :K], ref_cnt, atol=0.5)
    assert np.allclose(stats[1, :K], ref_sw, rtol=1e-4, atol=1e-2)
    assert np.allclose(stats[2, :K], ref_sh, rtol=1e-4, atol=1e-2)

    # --- ratio-distance assignment kernel check ---
    md2d, am2d = ratio_assign(anch_flat, bw2d, bh2d)
    md = np.asarray(md2d).reshape(-1)[:n]
    am = np.asarray(am2d).reshape(-1)[:n]
    ref_md, ref_am, ref_dist = _ref_ratio_assign(boxes_np, centers)
    assert np.allclose(md, ref_md, rtol=1e-4, atol=1e-4)
    mism = am != ref_am
    if mism.any():   # any argmin mismatch must be a numerical near-tie
        picked = ref_dist[np.arange(n), am]
        assert np.allclose(picked[mism], ref_md[mism], rtol=1e-5, atol=1e-6)

    assert result["initial_anchors_centers"].shape == (K, 2)
    assert result["best_children"].shape == (K, 2)
    assert all(0 <= i < K for i in result["assignement_nearest_id"])

    print("KERNEL_OK")
</pallas_src>

<mosaic_0001>
module attributes {stable_mosaic.version = 11 : i64} {
  func.func @_kmeans_stats_kernel(%arg0: i32, %arg1: memref<18xf32, #tpu.memory_space<smem>>, %arg2: memref<8x128xf32, #tpu.memory_space<vmem>>, %arg3: memref<8x128xf32, #tpu.memory_space<vmem>>, %arg4: memref<8x128xf32, #tpu.memory_space<vmem>>, %arg5: memref<8x128xf32, #tpu.memory_space<vmem>>) attributes {dimension_semantics = [#tpu.dimension_semantics<arbitrary>], iteration_bounds = array<i64: 1>, scalar_prefetch = 0 : i64, scratch_operands = 0 : i64, tpu.core_type = #tpu.core_type<tc>, window_params = [{transform_indices = @transform_0, window_bounds = array<i64: 18>}, {transform_indices = @transform_1, window_bounds = array<i64: 8, 128>}, {transform_indices = @transform_2, window_bounds = array<i64: 8, 128>}, {transform_indices = @transform_3, window_bounds = array<i64: 8, 128>}, {pipeline_mode = #tpu.pipeline_mode<synchronous>, transform_indices = @transform_4, window_bounds = array<i64: 8, 128>}]} {
    %c0_i32 = arith.constant 0 : i32
    %0 = arith.cmpi eq, %arg0, %c0_i32 : i32
    %1 = arith.extui %0 : i1 to i32
    %c0_i32_0 = arith.constant 0 : i32
    %2 = arith.cmpi ne, %1, %c0_i32_0 : i32
    scf.if %2 {
      %cst_104 = arith.constant 0.000000e+00 : f32
      %463 = vector.broadcast %cst_104 : f32 to vector<8x128xf32>
      %c0_105 = arith.constant 0 : index
      %c0_106 = arith.constant 0 : index
      %464 = vector.load %arg5[%c0_105, %c0_106] : memref<8x128xf32, #tpu.memory_space<vmem>>, vector<8x128xf32>
      tpu.vector_store %arg5[%c0_105, %c0_106], %463 {strides = array<i32>} : memref<8x128xf32, #tpu.memory_space<vmem>>, vector<8x128xf32>,
    } else {
    }
    %c0 = arith.constant 0 : index
    %c0_1 = arith.constant 0 : index
    %3 = vector.load %arg2[%c0, %c0_1] : memref<8x128xf32, #tpu.memory_space<vmem>>, vector<8x128xf32>
    %c0_2 = arith.constant 0 : index
    %c0_3 = arith.constant 0 : index
    %4 = vector.load %arg3[%c0_2, %c0_3] : memref<8x128xf32, #tpu.memory_space<vmem>>, vector<8x128xf32>
    %c0_4 = arith.constant 0 : index
    %c0_5 = arith.constant 0 : index
    %5 = vector.load %arg4[%c0_4, %c0_5] : memref<8x128xf32, #tpu.memory_space<vmem>>, vector<8x128xf32>
    %cst = arith.constant 0x7F800000 : f32
    %6 = vector.broadcast %cst : f32 to vector<8x128xf32>
    %c0_i32_6 = arith.constant 0 : i32
    %7 = vector.broadcast %c0_i32_6 : i32 to vector<8x128xi32>
    %c0_7 = arith.constant 0 : index
    %8 = memref.load %arg1[%c0_7] : memref<18xf32, #tpu.memory_space<smem>>
    %9 = vector.broadcast %8 : f32 to vector<8x128xf32>
    %10 = arith.subf %3, %9 : vector<8x128xf32>
    %c9 = arith.constant 9 : index
    %11 = memref.load %arg1[%c9] : memref<18xf32, #tpu.memory_space<smem>>
    %12 = vector.broadcast %11 : f32 to vector<8x128xf32>
    %13 = arith.subf %4, %12 : vector<8x128xf32>
    %14 = arith.mulf %10, %10 : vector<8x128xf32>
    %15 = arith.mulf %13, %13 : vector<8x128xf32>
    %16 = arith.addf %14, %15 : vector<8x128xf32>
    %17 = arith.cmpf olt, %16, %6 : vector<8x128xf32>
    %18 = arith.select %17, %16, %6 : vector<8x128xi1>, vector<8x128xf32>
    %c0_i32_8 = arith.constant 0 : i32
    %19 = vector.broadcast %c0_i32_8 : i32 to vector<8x128xi32>
    %20 = arith.select %17, %19, %7 : vector<8x128xi1>, vector<8x128xi32>
    %c1 = arith.constant 1 : index
    %21 = memref.load %arg1[%c1] : memref<18xf32, #tpu.memory_space<smem>>
    %22 = vector.broadcast %21 : f32 to vector<8x128xf32>
    %23 = arith.subf %3, %22 : vector<8x128xf32>
    %c10 = arith.constant 10 : index
    %24 = memref.load %arg1[%c10] : memref<18xf32, #tpu.memory_space<smem>>
    %25 = vector.broadcast %24 : f32 to vector<8x128xf32>
    %26 = arith.subf %4, %25 : vector<8x128xf32>
    %27 = arith.mulf %23, %23 : vector<8x128xf32>
    %28 = arith.mulf %26, %26 : vector<8x128xf32>
    %29 = arith.addf %27, %28 : vector<8x128xf32>
    %30 = arith.cmpf olt, %29, %18 : vector<8x128xf32>
    %31 = arith.select %30, %29, %18 : vector<8x128xi1>, vector<8x128xf32>
    %c1_i32 = arith.constant 1 : i32
    %32 = vector.broadcast %c1_i32 : i32 to vector<8x128xi32>
    %33 = arith.select %30, %32, %20 : vector<8x128xi1>, vector<8x128xi32>
    %c2 = arith.constant 2 : index
    %34 = memref.load %arg1[%c2] : memref<18xf32, #tpu.memory_space<smem>>
    %35 = vector.broadcast %34 : f32 to vector<8x128xf32>
    %36 = arith.subf %3, %35 : vector<8x128xf32>
    %c11 = arith.constant 11 : index
    %37 = memref.load %arg1[%c11] : memref<18xf32, #tpu.memory_space<smem>>
    %38 = vector.broadcast %37 : f32 to vector<8x128xf32>
    %39 = arith.subf %4, %38 : vector<8x128xf32>
    %40 = arith.mulf %36, %36 : vector<8x128xf32>
    %41 = arith.mulf %39, %39 : vector<8x128xf32>
    %42 = arith.addf %40, %41 : vector<8x128xf32>
    %43 = arith.cmpf olt, %42, %31 : vector<8x128xf32>
    %44 = arith.select %43, %42, %31 : vector<8x128xi1>, vector<8x128xf32>
    %c2_i32 = arith.constant 2 : i32
    %45 = vector.broadcast %c2_i32 : i32 to vector<8x128xi32>
    %46 = arith.select %43, %45, %33 : vector<8x128xi1>, vector<8x128xi32>
    %c3 = arith.constant 3 : index
    %47 = memref.load %arg1[%c3] : memref<18xf32, #tpu.memory_space<smem>>
    %48 = vector.broadcast %47 : f32 to vector<8x128xf32>
    %49 = arith.subf %3, %48 : vector<8x128xf32>
    %c12 = arith.constant 12 : index
    %50 = memref.load %arg1[%c12] : memref<18xf32, #tpu.memory_space<smem>>
    %51 = vector.broadcast %50 : f32 to vector<8x128xf32>
    %52 = arith.subf %4, %51 : vector<8x128xf32>
    %53 = arith.mulf %49, %49 : vector<8x128xf32>
    %54 = arith.mulf %52, %52 : vector<8x128xf32>
    %55 = arith.addf %53, %54 : vector<8x128xf32>
    %56 = arith.cmpf olt, %55, %44 : vector<8x128xf32>
    %57 = arith.select %56, %55, %44 : vector<8x128xi1>, vector<8x128xf32>
    %c3_i32 = arith.constant 3 : i32
    %58 = vector.broadcast %c3_i32 : i32 to vector<8x128xi32>
    %59 = arith.select %56, %58, %46 : vector<8x128xi1>, vector<8x128xi32>
    %c4 = arith.constant 4 : index
    %60 = memref.load %arg1[%c4] : memref<18xf32, #tpu.memory_space<smem>>
    %61 = vector.broadcast %60 : f32 to vector<8x128xf32>
    %62 = arith.subf %3, %61 : vector<8x128xf32>
    %c13 = arith.constant 13 : index
    %63 = memref.load %arg1[%c13] : memref<18xf32, #tpu.memory_space<smem>>
    %64 = vector.broadcast %63 : f32 to vector<8x128xf32>
    %65 = arith.subf %4, %64 : vector<8x128xf32>
    %66 = arith.mulf %62, %62 : vector<8x128xf32>
    %67 = arith.mulf %65, %65 : vector<8x128xf32>
    %68 = arith.addf %66, %67 : vector<8x128xf32>
    %69 = arith.cmpf olt, %68, %57 : vector<8x128xf32>
    %70 = arith.select %69, %68, %57 : vector<8x128xi1>, vector<8x128xf32>
    %c4_i32 = arith.constant 4 : i32
    %71 = vector.broadcast %c4_i32 : i32 to vector<8x128xi32>
    %72 = arith.select %69, %71, %59 : vector<8x128xi1>, vector<8x128xi32>
    %c5 = arith.constant 5 : index
    %73 = memref.load %arg1[%c5] : memref<18xf32, #tpu.memory_space<smem>>
    %74 = vector.broadcast %73 : f32 to vector<8x128xf32>
    %75 = arith.subf %3, %74 : vector<8x128xf32>
    %c14 = arith.constant 14 : index
    %76 = memref.load %arg1[%c14] : memref<18xf32, #tpu.memory_space<smem>>
    %77 = vector.broadcast %76 : f32 to vector<8x128xf32>
    %78 = arith.subf %4, %77 : vector<8x128xf32>
    %79 = arith.mulf %75, %75 : vector<8x128xf32>
    %80 = arith.mulf %78, %78 : vector<8x128xf32>
    %81 = arith.addf %79, %80 : vector<8x128xf32>
    %82 = arith.cmpf olt, %81, %70 : vector<8x128xf32>
    %83 = arith.select %82, %81, %70 : vector<8x128xi1>, vector<8x128xf32>
    %c5_i32 = arith.constant 5 : i32
    %84 = vector.broadcast %c5_i32 : i32 to vector<8x128xi32>
    %85 = arith.select %82, %84, %72 : vector<8x128xi1>, vector<8x128xi32>
    %c6 = arith.constant 6 : index
    %86 = memref.load %arg1[%c6] : memref<18xf32, #tpu.memory_space<smem>>
    %87 = vector.broadcast %86 : f32 to vector<8x128xf32>
    %88 = arith.subf %3, %87 : vector<8x128xf32>
    %c15 = arith.constant 15 : index
    %89 = memref.load %arg1[%c15] : memref<18xf32, #tpu.memory_space<smem>>
    %90 = vector.broadcast %89 : f32 to vector<8x128xf32>
    %91 = arith.subf %4, %90 : vector<8x128xf32>
    %92 = arith.mulf %88, %88 : vector<8x128xf32>
    %93 = arith.mulf %91, %91 : vector<8x128xf32>
    %94 = arith.addf %92, %93 : vector<8x128xf32>
    %95 = arith.cmpf olt, %94, %83 : vector<8x128xf32>
    %96 = arith.select %95, %94, %83 : vector<8x128xi1>, vector<8x128xf32>
    %c6_i32 = arith.constant 6 : i32
    %97 = vector.broadcast %c6_i32 : i32 to vector<8x128xi32>
    %98 = arith.select %95, %97, %85 : vector<8x128xi1>, vector<8x128xi32>
    %c7 = arith.constant 7 : index
    %99 = memref.load %arg1[%c7] : memref<18xf32, #tpu.memory_space<smem>>
    %100 = vector.broadcast %99 : f32 to vector<8x128xf32>
    %101 = arith.subf %3, %100 : vector<8x128xf32>
    %c16 = arith.constant 16 : index
    %102 = memref.load %arg1[%c16] : memref<18xf32, #tpu.memory_space<smem>>
    %103 = vector.broadcast %102 : f32 to vector<8x128xf32>
    %104 = arith.subf %4, %103 : vector<8x128xf32>
    %105 = arith.mulf %101, %101 : vector<8x128xf32>
    %106 = arith.mulf %104, %104 : vector<8x128xf32>
    %107 = arith.addf %105, %106 : vector<8x128xf32>
    %108 = arith.cmpf olt, %107, %96 : vector<8x128xf32>
    %109 = arith.select %108, %107, %96 : vector<8x128xi1>, vector<8x128xf32>
    %c7_i32 = arith.constant 7 : i32
    %110 = vector.broadcast %c7_i32 : i32 to vector<8x128xi32>
    %111 = arith.select %108, %110, %98 : vector<8x128xi1>, vector<8x128xi32>
    %c8 = arith.constant 8 : index
    %112 = memref.load %arg1[%c8] : memref<18xf32, #tpu.memory_space<smem>>
    %113 = vector.broadcast %112 : f32 to vector<8x128xf32>
    %114 = arith.subf %3, %113 : vector<8x128xf32>
    %c17 = arith.constant 17 : index
    %115 = memref.load %arg1[%c17] : memref<18xf32, #tpu.memory_space<smem>>
    %116 = vector.broadcast %115 : f32 to vector<8x128xf32>
    %117 = arith.subf %4, %116 : vector<8x128xf32>
    %118 = arith.mulf %114, %114 : vector<8x128xf32>
    %119 = arith.mulf %117, %117 : vector<8x128xf32>
    %120 = arith.addf %118, %119 : vector<8x128xf32>
    %121 = arith.cmpf olt, %120, %109 : vector<8x128xf32>
    %c8_i32 = arith.constant 8 : i32
    %122 = vector.broadcast %c8_i32 : i32 to vector<8x128xi32>
    %123 = arith.select %121, %122, %111 : vector<8x128xi1>, vector<8x128xi32>
    %124 = tpu.iota {dimensions = array<i32: 0>} : vector<8x128xi32>
    %125 = tpu.iota {dimensions = array<i32: 1>} : vector<8x128xi32>
    %cst_9 = arith.constant 0.000000e+00 : f32
    %126 = vector.broadcast %cst_9 : f32 to vector<8x128xf32>
    %c0_i32_10 = arith.constant 0 : i32
    %127 = vector.broadcast %c0_i32_10 : i32 to vector<8x128xi32>
    %128 = arith.cmpi eq, %123, %127 : vector<8x128xi32>
    %cst_11 = arith.constant 0.000000e+00 : f32
    %129 = vector.broadcast %cst_11 : f32 to vector<8x128xf32>
    %130 = arith.select %128, %5, %129 : vector<8x128xi1>, vector<8x128xf32>
    %131 = vector.shape_cast %130 : vector<8x128xf32> to vector<1x8x128xf32>
    %cst_12 = arith.constant dense<0.000000e+00> : vector<1xf32>
    %132 = vector.multi_reduction <add>, %131, %cst_12 [1, 2] : vector<1x8x128xf32> to vector<1xf32>
    %133 = vector.shape_cast %132 : vector<1xf32> to vector<1x1x1xf32>
    %134 = vector.extract %133[0, 0, 0] : f32 from vector<1x1x1xf32>
    %135 = arith.mulf %130, %3 : vector<8x128xf32>
    %136 = vector.shape_cast %135 : vector<8x128xf32> to vector<1x8x128xf32>
    %cst_13 = arith.constant dense<0.000000e+00> : vector<1xf32>
    %137 = vector.multi_reduction <add>, %136, %cst_13 [1, 2] : vector<1x8x128xf32> to vector<1xf32>
    %138 = vector.shape_cast %137 : vector<1xf32> to vector<1x1x1xf32>
    %139 = vector.extract %138[0, 0, 0] : f32 from vector<1x1x1xf32>
    %140 = arith.mulf %130, %4 : vector<8x128xf32>
    %141 = vector.shape_cast %140 : vector<8x128xf32> to vector<1x8x128xf32>
    %cst_14 = arith.constant dense<0.000000e+00> : vector<1xf32>
    %142 = vector.multi_reduction <add>, %141, %cst_14 [1, 2] : vector<1x8x128xf32> to vector<1xf32>
    %143 = vector.shape_cast %142 : vector<1xf32> to vector<1x1x1xf32>
    %144 = vector.extract %143[0, 0, 0] : f32 from vector<1x1x1xf32>
    %c0_i32_15 = arith.constant 0 : i32
    %145 = vector.broadcast %c0_i32_15 : i32 to vector<8x128xi32>
    %146 = arith.cmpi eq, %125, %145 : vector<8x128xi32>
    %c0_i32_16 = arith.constant 0 : i32
    %147 = vector.broadcast %c0_i32_16 : i32 to vector<8x128xi32>
    %148 = arith.cmpi eq, %124, %147 : vector<8x128xi32>
    %149 = arith.andi %148, %146 : vector<8x128xi1>
    %c1_i32_17 = arith.constant 1 : i32
    %150 = vector.broadcast %c1_i32_17 : i32 to vector<8x128xi32>
    %151 = arith.cmpi eq, %124, %150 : vector<8x128xi32>
    %152 = arith.andi %151, %146 : vector<8x128xi1>
    %c2_i32_18 = arith.constant 2 : i32
    %153 = vector.broadcast %c2_i32_18 : i32 to vector<8x128xi32>
    %154 = arith.cmpi eq, %124, %153 : vector<8x128xi32>
    %155 = arith.andi %154, %146 : vector<8x128xi1>
    %cst_19 = arith.constant 0.000000e+00 : f32
    %156 = vector.broadcast %144 : f32 to vector<8x128xf32>
    %157 = vector.broadcast %cst_19 : f32 to vector<8x128xf32>
    %158 = arith.select %155, %156, %157 : vector<8x128xi1>, vector<8x128xf32>
    %159 = vector.broadcast %139 : f32 to vector<8x128xf32>
    %160 = arith.select %152, %159, %158 : vector<8x128xi1>, vector<8x128xf32>
    %161 = vector.broadcast %134 : f32 to vector<8x128xf32>
    %162 = arith.select %149, %161, %160 : vector<8x128xi1>, vector<8x128xf32>
    %163 = arith.addf %126, %162 : vector<8x128xf32>
    %c1_i32_20 = arith.constant 1 : i32
    %164 = vector.broadcast %c1_i32_20 : i32 to vector<8x128xi32>
    %165 = arith.cmpi eq, %123, %164 : vector<8x128xi32>
    %cst_21 = arith.constant 0.000000e+00 : f32
    %166 = vector.broadcast %cst_21 : f32 to vector<8x128xf32>
    %167 = arith.select %165, %5, %166 : vector<8x128xi1>, vector<8x128xf32>
    %168 = vector.shape_cast %167 : vector<8x128xf32> to vector<1x8x128xf32>
    %cst_22 = arith.constant dense<0.000000e+00> : vector<1xf32>
    %169 = vector.multi_reduction <add>, %168, %cst_22 [1, 2] : vector<1x8x128xf32> to vector<1xf32>
    %170 = vector.shape_cast %169 : vector<1xf32> to vector<1x1x1xf32>
    %171 = vector.extract %170[0, 0, 0] : f32 from vector<1x1x1xf32>
    %172 = arith.mulf %167, %3 : vector<8x128xf32>
    %173 = vector.shape_cast %172 : vector<8x128xf32> to vector<1x8x128xf32>
    %cst_23 = arith.constant dense<0.000000e+00> : vector<1xf32>
    %174 = vector.multi_reduction <add>, %173, %cst_23 [1, 2] : vector<1x8x128xf32> to vector<1xf32>
    %175 = vector.shape_cast %174 : vector<1xf32> to vector<1x1x1xf32>
    %176 = vector.extract %175[0, 0, 0] : f32 from vector<1x1x1xf32>
    %177 = arith.mulf %167, %4 : vector<8x128xf32>
    %178 = vector.shape_cast %177 : vector<8x128xf32> to vector<1x8x128xf32>
    %cst_24 = arith.constant dense<0.000000e+00> : vector<1xf32>
    %179 = vector.multi_reduction <add>, %178, %cst_24 [1, 2] : vector<1x8x128xf32> to vector<1xf32>
    %180 = vector.shape_cast %179 : vector<1xf32> to vector<1x1x1xf32>
    %181 = vector.extract %180[0, 0, 0] : f32 from vector<1x1x1xf32>
    %c1_i32_25 = arith.constant 1 : i32
    %182 = vector.broadcast %c1_i32_25 : i32 to vector<8x128xi32>
    %183 = arith.cmpi eq, %125, %182 : vector<8x128xi32>
    %c0_i32_26 = arith.constant 0 : i32
    %184 = vector.broadcast %c0_i32_26 : i32 to vector<8x128xi32>
    %185 = arith.cmpi eq, %124, %184 : vector<8x128xi32>
    %186 = arith.andi %185, %183 : vector<8x128xi1>
    %c1_i32_27 = arith.constant 1 : i32
    %187 = vector.broadcast %c1_i32_27 : i32 to vector<8x128xi32>
    %188 = arith.cmpi eq, %124, %187 : vector<8x128xi32>
    %189 = arith.andi %188, %183 : vector<8x128xi1>
    %c2_i32_28 = arith.constant 2 : i32
    %190 = vector.broadcast %c2_i32_28 : i32 to vector<8x128xi32>
    %191 = arith.cmpi eq, %124, %190 : vector<8x128xi32>
    %192 = arith.andi %191, %183 : vector<8x128xi1>
    %cst_29 = arith.constant 0.000000e+00 : f32
    %193 = vector.broadcast %181 : f32 to vector<8x128xf32>
    %194 = vector.broadcast %cst_29 : f32 to vector<8x128xf32>
    %195 = arith.select %192, %193, %194 : vector<8x128xi1>, vector<8x128xf32>
    %196 = vector.broadcast %176 : f32 to vector<8x128xf32>
    %197 = arith.select %189, %196, %195 : vector<8x128xi1>, vector<8x128xf32>
    %198 = vector.broadcast %171 : f32 to vector<8x128xf32>
    %199 = arith.select %186, %198, %197 : vector<8x128xi1>, vector<8x128xf32>
    %200 = arith.addf %163, %199 : vector<8x128xf32>
    %c2_i32_30 = arith.constant 2 : i32
    %201 = vector.broadcast %c2_i32_30 : i32 to vector<8x128xi32>
    %202 = arith.cmpi eq, %123, %201 : vector<8x128xi32>
    %cst_31 = arith.constant 0.000000e+00 : f32
    %203 = vector.broadcast %cst_31 : f32 to vector<8x128xf32>
    %204 = arith.select %202, %5, %203 : vector<8x128xi1>, vector<8x128xf32>
    %205 = vector.shape_cast %204 : vector<8x128xf32> to vector<1x8x128xf32>
    %cst_32 = arith.constant dense<0.000000e+00> : vector<1xf32>
    %206 = vector.multi_reduction <add>, %205, %cst_32 [1, 2] : vector<1x8x128xf32> to vector<1xf32>
    %207 = vector.shape_cast %206 : vector<1xf32> to vector<1x1x1xf32>
    %208 = vector.extract %207[0, 0, 0] : f32 from vector<1x1x1xf32>
    %209 = arith.mulf %204, %3 : vector<8x128xf32>
    %210 = vector.shape_cast %209 : vector<8x128xf32> to vector<1x8x128xf32>
    %cst_33 = arith.constant dense<0.000000e+00> : vector<1xf32>
    %211 = vector.multi_reduction <add>, %210, %cst_33 [1, 2] : vector<1x8x128xf32> to vector<1xf32>
    %212 = vector.shape_cast %211 : vector<1xf32> to vector<1x1x1xf32>
    %213 = vector.extract %212[0, 0, 0] : f32 from vector<1x1x1xf32>
    %214 = arith.mulf %204, %4 : vector<8x128xf32>
    %215 = vector.shape_cast %214 : vector<8x128xf32> to vector<1x8x128xf32>
    %cst_34 = arith.constant dense<0.000000e+00> : vector<1xf32>
    %216 = vector.multi_reduction <add>, %215, %cst_34 [1, 2] : vector<1x8x128xf32> to vector<1xf32>
    %217 = vector.shape_cast %216 : vector<1xf32> to vector<1x1x1xf32>
    %218 = vector.extract %217[0, 0, 0] : f32 from vector<1x1x1xf32>
    %c2_i32_35 = arith.constant 2 : i32
    %219 = vector.broadcast %c2_i32_35 : i32 to vector<8x128xi32>
    %220 = arith.cmpi eq, %125, %219 : vector<8x128xi32>
    %c0_i32_36 = arith.constant 0 : i32
    %221 = vector.broadcast %c0_i32_36 : i32 to vector<8x128xi32>
    %222 = arith.cmpi eq, %124, %221 : vector<8x128xi32>
    %223 = arith.andi %222, %220 : vector<8x128xi1>
    %c1_i32_37 = arith.constant 1 : i32
    %224 = vector.broadcast %c1_i32_37 : i32 to vector<8x128xi32>
    %225 = arith.cmpi eq, %124, %224 : vector<8x128xi32>
    %226 = arith.andi %225, %220 : vector<8x128xi1>
    %c2_i32_38 = arith.constant 2 : i32
    %227 = vector.broadcast %c2_i32_38 : i32 to vector<8x128xi32>
    %228 = arith.cmpi eq, %124, %227 : vector<8x128xi32>
    %229 = arith.andi %228, %220 : vector<8x128xi1>
    %cst_39 = arith.constant 0.000000e+00 : f32
    %230 = vector.broadcast %218 : f32 to vector<8x128xf32>
    %231 = vector.broadcast %cst_39 : f32 to vector<8x128xf32>
    %232 = arith.select %229, %230, %231 : vector<8x128xi1>, vector<8x128xf32>
    %233 = vector.broadcast %213 : f32 to vector<8x128xf32>
    %234 = arith.select %226, %233, %232 : vector<8x128xi1>, vector<8x128xf32>
    %235 = vector.broadcast %208 : f32 to vector<8x128xf32>
    %236 = arith.select %223, %235, %234 : vector<8x128xi1>, vector<8x128xf32>
    %237 = arith.addf %200, %236 : vector<8x128xf32>
    %c3_i32_40 = arith.constant 3 : i32
    %238 = vector.broadcast %c3_i32_40 : i32 to vector<8x128xi32>
    %239 = arith.cmpi eq, %123, %238 : vector<8x128xi32>
    %cst_41 = arith.constant 0.000000e+00 : f32
    %240 = vector.broadcast %cst_41 : f32 to vector<8x128xf32>
    %241 = arith.select %239, %5, %240 : vector<8x128xi1>, vector<8x128xf32>
    %242 = vector.shape_cast %241 : vector<8x128xf32> to vector<1x8x128xf32>
    %cst_42 = arith.constant dense<0.000000e+00> : vector<1xf32>
    %243 = vector.multi_reduction <add>, %242, %cst_42 [1, 2] : vector<1x8x128xf32> to vector<1xf32>
    %244 = vector.shape_cast %243 : vector<1xf32> to vector<1x1x1xf32>
    %245 = vector.extract %244[0, 0, 0] : f32 from vector<1x1x1xf32>
    %246 = arith.mulf %241, %3 : vector<8x128xf32>
    %247 = vector.shape_cast %246 : vector<8x128xf32> to vector<1x8x128xf32>
    %cst_43 = arith.constant dense<0.000000e+00> : vector<1xf32>
    %248 = vector.multi_reduction <add>, %247, %cst_43 [1, 2] : vector<1x8x128xf32> to vector<1xf32>
    %249 = vector.shape_cast %248 : vector<1xf32> to vector<1x1x1xf32>
    %250 = vector.extract %249[0, 0, 0] : f32 from vector<1x1x1xf32>
    %251 = arith.mulf %241, %4 : vector<8x128xf32>
    %252 = vector.shape_cast %251 : vector<8x128xf32> to vector<1x8x128xf32>
    %cst_44 = arith.constant dense<0.000000e+00> : vector<1xf32>
    %253 = vector.multi_reduction <add>, %252, %cst_44 [1, 2] : vector<1x8x128xf32> to vector<1xf32>
    %254 = vector.shape_cast %253 : vector<1xf32> to vector<1x1x1xf32>
    %255 = vector.extract %254[0, 0, 0] : f32 from vector<1x1x1xf32>
    %c3_i32_45 = arith.constant 3 : i32
    %256 = vector.broadcast %c3_i32_45 : i32 to vector<8x128xi32>
    %257 = arith.cmpi eq, %125, %256 : vector<8x128xi32>
    %c0_i32_46 = arith.constant 0 : i32
    %258 = vector.broadcast %c0_i32_46 : i32 to vector<8x128xi32>
    %259 = arith.cmpi eq, %124, %258 : vector<8x128xi32>
    %260 = arith.andi %259, %257 : vector<8x128xi1>
    %c1_i32_47 = arith.constant 1 : i32
    %261 = vector.broadcast %c1_i32_47 : i32 to vector<8x128xi32>
    %262 = arith.cmpi eq, %124, %261 : vector<8x128xi32>
    %263 = arith.andi %262, %257 : vector<8x128xi1>
    %c2_i32_48 = arith.constant 2 : i32
    %264 = vector.broadcast %c2_i32_48 : i32 to vector<8x128xi32>
    %265 = arith.cmpi eq, %124, %264 : vector<8x128xi32>
    %266 = arith.andi %265, %257 : vector<8x128xi1>
    %cst_49 = arith.constant 0.000000e+00 : f32
    %267 = vector.broadcast %255 : f32 to vector<8x128xf32>
    %268 = vector.broadcast %cst_49 : f32 to vector<8x128xf32>
    %269 = arith.select %266, %267, %268 : vector<8x128xi1>, vector<8x128xf32>
    %270 = vector.broadcast %250 : f32 to vector<8x128xf32>
    %271 = arith.select %263, %270, %269 : vector<8x128xi1>, vector<8x128xf32>
    %272 = vector.broadcast %245 : f32 to vector<8x128xf32>
    %273 = arith.select %260, %272, %271 : vector<8x128xi1>, vector<8x128xf32>
    %274 = arith.addf %237, %273 : vector<8x128xf32>
    %c4_i32_50 = arith.constant 4 : i32
    %275 = vector.broadcast %c4_i32_50 : i32 to vector<8x128xi32>
    %276 = arith.cmpi eq, %123, %275 : vector<8x128xi32>
    %cst_51 = arith.constant 0.000000e+00 : f32
    %277 = vector.broadcast %cst_51 : f32 to vector<8x128xf32>
    %278 = arith.select %276, %5, %277 : vector<8x128xi1>, vector<8x128xf32>
    %279 = vector.shape_cast %278 : vector<8x128xf32> to vector<1x8x128xf32>
    %cst_52 = arith.constant dense<0.000000e+00> : vector<1xf32>
    %280 = vector.multi_reduction <add>, %279, %cst_52 [1, 2] : vector<1x8x128xf32> to vector<1xf32>
    %281 = vector.shape_cast %280 : vector<1xf32> to vector<1x1x1xf32>
    %282 = vector.extract %281[0, 0, 0] : f32 from vector<1x1x1xf32>
    %283 = arith.mulf %278, %3 : vector<8x128xf32>
    %284 = vector.shape_cast %283 : vector<8x128xf32> to vector<1x8x128xf32>
    %cst_53 = arith.constant dense<0.000000e+00> : vector<1xf32>
    %285 = vector.multi_reduction <add>, %284, %cst_53 [1, 2] : vector<1x8x128xf32> to vector<1xf32>
    %286 = vector.shape_cast %285 : vector<1xf32> to vector<1x1x1xf32>
    %287 = vector.extract %286[0, 0, 0] : f32 from vector<1x1x1xf32>
    %288 = arith.mulf %278, %4 : vector<8x128xf32>
    %289 = vector.shape_cast %288 : vector<8x128xf32> to vector<1x8x128xf32>
    %cst_54 = arith.constant dense<0.000000e+00> : vector<1xf32>
    %290 = vector.multi_reduction <add>, %289, %cst_54 [1, 2] : vector<1x8x128xf32> to vector<1xf32>
    %291 = vector.shape_cast %290 : vector<1xf32> to vector<1x1x1xf32>
    %292 = vector.extract %291[0, 0, 0] : f32 from vector<1x1x1xf32>
    %c4_i32_55 = arith.constant 4 : i32
    %293 = vector.broadcast %c4_i32_55 : i32 to vector<8x128xi32>
    %294 = arith.cmpi eq, %125, %293 : vector<8x128xi32>
    %c0_i32_56 = arith.constant 0 : i32
    %295 = vector.broadcast %c0_i32_56 : i32 to vector<8x128xi32>
    %296 = arith.cmpi eq, %124, %295 : vector<8x128xi32>
    %297 = arith.andi %296, %294 : vector<8x128xi1>
    %c1_i32_57 = arith.constant 1 : i32
    %298 = vector.broadcast %c1_i32_57 : i32 to vector<8x128xi32>
    %299 = arith.cmpi eq, %124, %298 : vector<8x128xi32>
    %300 = arith.andi %299, %294 : vector<8x128xi1>
    %c2_i32_58 = arith.constant 2 : i32
    %301 = vector.broadcast %c2_i32_58 : i32 to vector<8x128xi32>
    %302 = arith.cmpi eq, %124, %301 : vector<8x128xi32>
    %303 = arith.andi %302, %294 : vector<8x128xi1>
    %cst_59 = arith.constant 0.000000e+00 : f32
    %304 = vector.broadcast %292 : f32 to vector<8x128xf32>
    %305 = vector.broadcast %cst_59 : f32 to vector<8x128xf32>
    %306 = arith.select %303, %304, %305 : vector<8x128xi1>, vector<8x128xf32>
    %307 = vector.broadcast %287 : f32 to vector<8x128xf32>
    %308 = arith.select %300, %307, %306 : vector<8x128xi1>, vector<8x128xf32>
    %309 = vector.broadcast %282 : f32 to vector<8x128xf32>
    %310 = arith.select %297, %309, %308 : vector<8x128xi1>, vector<8x128xf32>
    %311 = arith.addf %274, %310 : vector<8x128xf32>
    %c5_i32_60 = arith.constant 5 : i32
    %312 = vector.broadcast %c5_i32_60 : i32 to vector<8x128xi32>
    %313 = arith.cmpi eq, %123, %312 : vector<8x128xi32>
    %cst_61 = arith.constant 0.000000e+00 : f32
    %314 = vector.broadcast %cst_61 : f32 to vector<8x128xf32>
    %315 = arith.select %313, %5, %314 : vector<8x128xi1>, vector<8x128xf32>
    %316 = vector.shape_cast %315 : vector<8x128xf32> to vector<1x8x128xf32>
    %cst_62 = arith.constant dense<0.000000e+00> : vector<1xf32>
    %317 = vector.multi_reduction <add>, %316, %cst_62 [1, 2] : vector<1x8x128xf32> to vector<1xf32>
    %318 = vector.shape_cast %317 : vector<1xf32> to vector<1x1x1xf32>
    %319 = vector.extract %318[0, 0, 0] : f32 from vector<1x1x1xf32>
    %320 = arith.mulf %315, %3 : vector<8x128xf32>
    %321 = vector.shape_cast %320 : vector<8x128xf32> to vector<1x8x128xf32>
    %cst_63 = arith.constant dense<0.000000e+00> : vector<1xf32>
    %322 = vector.multi_reduction <add>, %321, %cst_63 [1, 2] : vector<1x8x128xf32> to vector<1xf32>
    %323 = vector.shape_cast %322 : vector<1xf32> to vector<1x1x1xf32>
    %324 = vector.extract %323[0, 0, 0] : f32 from vector<1x1x1xf32>
    %325 = arith.mulf %315, %4 : vector<8x128xf32>
    %326 = vector.shape_cast %325 : vector<8x128xf32> to vector<1x8x128xf32>
    %cst_64 = arith.constant dense<0.000000e+00> : vector<1xf32>
    %327 = vector.multi_reduction <add>, %326, %cst_64 [1, 2] : vector<1x8x128xf32> to vector<1xf32>
    %328 = vector.shape_cast %327 : vector<1xf32> to vector<1x1x1xf32>
    %329 = vector.extract %328[0, 0, 0] : f32 from vector<1x1x1xf32>
    %c5_i32_65 = arith.constant 5 : i32
    %330 = vector.broadcast %c5_i32_65 : i32 to vector<8x128xi32>
    %331 = arith.cmpi eq, %125, %330 : vector<8x128xi32>
    %c0_i32_66 = arith.constant 0 : i32
    %332 = vector.broadcast %c0_i32_66 : i32 to vector<8x128xi32>
    %333 = arith.cmpi eq, %124, %332 : vector<8x128xi32>
    %334 = arith.andi %333, %331 : vector<8x128xi1>
    %c1_i32_67 = arith.constant 1 : i32
    %335 = vector.broadcast %c1_i32_67 : i32 to vector<8x128xi32>
    %336 = arith.cmpi eq, %124, %335 : vector<8x128xi32>
    %337 = arith.andi %336, %331 : vector<8x128xi1>
    %c2_i32_68 = arith.constant 2 : i32
    %338 = vector.broadcast %c2_i32_68 : i32 to vector<8x128xi32>
    %339 = arith.cmpi eq, %124, %338 : vector<8x128xi32>
    %340 = arith.andi %339, %331 : vector<8x128xi1>
    %cst_69 = arith.constant 0.000000e+00 : f32
    %341 = vector.broadcast %329 : f32 to vector<8x128xf32>
    %342 = vector.broadcast %cst_69 : f32 to vector<8x128xf32>
    %343 = arith.select %340, %341, %342 : vector<8x128xi1>, vector<8x128xf32>
    %344 = vector.broadcast %324 : f32 to vector<8x128xf32>
    %345 = arith.select %337, %344, %343 : vector<8x128xi1>, vector<8x128xf32>
    %346 = vector.broadcast %319 : f32 to vector<8x128xf32>
    %347 = arith.select %334, %346, %345 : vector<8x128xi1>, vector<8x128xf32>
    %348 = arith.addf %311, %347 : vector<8x128xf32>
    %c6_i32_70 = arith.constant 6 : i32
    %349 = vector.broadcast %c6_i32_70 : i32 to vector<8x128xi32>
    %350 = arith.cmpi eq, %123, %349 : vector<8x128xi32>
    %cst_71 = arith.constant 0.000000e+00 : f32
    %351 = vector.broadcast %cst_71 : f32 to vector<8x128xf32>
    %352 = arith.select %350, %5, %351 : vector<8x128xi1>, vector<8x128xf32>
    %353 = vector.shape_cast %352 : vector<8x128xf32> to vector<1x8x128xf32>
    %cst_72 = arith.constant dense<0.000000e+00> : vector<1xf32>
    %354 = vector.multi_reduction <add>, %353, %cst_72 [1, 2] : vector<1x8x128xf32> to vector<1xf32>
    %355 = vector.shape_cast %354 : vector<1xf32> to vector<1x1x1xf32>
    %356 = vector.extract %355[0, 0, 0] : f32 from vector<1x1x1xf32>
    %357 = arith.mulf %352, %3 : vector<8x128xf32>
    %358 = vector.shape_cast %357 : vector<8x128xf32> to vector<1x8x128xf32>
    %cst_73 = arith.constant dense<0.000000e+00> : vector<1xf32>
    %359 = vector.multi_reduction <add>, %358, %cst_73 [1, 2] : vector<1x8x128xf32> to vector<1xf32>
    %360 = vector.shape_cast %359 : vector<1xf32> to vector<1x1x1xf32>
    %361 = vector.extract %360[0, 0, 0] : f32 from vector<1x1x1xf32>
    %362 = arith.mulf %352, %4 : vector<8x128xf32>
    %363 = vector.shape_cast %362 : vector<8x128xf32> to vector<1x8x128xf32>
    %cst_74 = arith.constant dense<0.000000e+00> : vector<1xf32>
    %364 = vector.multi_reduction <add>, %363, %cst_74 [1, 2] : vector<1x8x128xf32> to vector<1xf32>
    %365 = vector.shape_cast %364 : vector<1xf32> to vector<1x1x1xf32>
    %366 = vector.extract %365[0, 0, 0] : f32 from vector<1x1x1xf32>
    %c6_i32_75 = arith.constant 6 : i32
    %367 = vector.broadcast %c6_i32_75 : i32 to vector<8x128xi32>
    %368 = arith.cmpi eq, %125, %367 : vector<8x128xi32>
    %c0_i32_76 = arith.constant 0 : i32
    %369 = vector.broadcast %c0_i32_76 : i32 to vector<8x128xi32>
    %370 = arith.cmpi eq, %124, %369 : vector<8x128xi32>
    %371 = arith.andi %370, %368 : vector<8x128xi1>
    %c1_i32_77 = arith.constant 1 : i32
    %372 = vector.broadcast %c1_i32_77 : i32 to vector<8x128xi32>
    %373 = arith.cmpi eq, %124, %372 : vector<8x128xi32>
    %374 = arith.andi %373, %368 : vector<8x128xi1>
    %c2_i32_78 = arith.constant 2 : i32
    %375 = vector.broadcast %c2_i32_78 : i32 to vector<8x128xi32>
    %376 = arith.cmpi eq, %124, %375 : vector<8x128xi32>
    %377 = arith.andi %376, %368 : vector<8x128xi1>
    %cst_79 = arith.constant 0.000000e+00 : f32
    %378 = vector.broadcast %366 : f32 to vector<8x128xf32>
    %379 = vector.broadcast %cst_79 : f32 to vector<8x128xf32>
    %380 = arith.select %377, %378, %379 : vector<8x128xi1>, vector<8x128xf32>
    %381 = vector.broadcast %361 : f32 to vector<8x128xf32>
    %382 = arith.select %374, %381, %380 : vector<8x128xi1>, vector<8x128xf32>
    %383 = vector.broadcast %356 : f32 to vector<8x128xf32>
    %384 = arith.select %371, %383, %382 : vector<8x128xi1>, vector<8x128xf32>
    %385 = arith.addf %348, %384 : vector<8x128xf32>
    %c7_i32_80 = arith.constant 7 : i32
    %386 = vector.broadcast %c7_i32_80 : i32 to vector<8x128xi32>
    %387 = arith.cmpi eq, %123, %386 : vector<8x128xi32>
    %cst_81 = arith.constant 0.000000e+00 : f32
    %388 = vector.broadcast %cst_81 : f32 to vector<8x128xf32>
    %389 = arith.select %387, %5, %388 : vector<8x128xi1>, vector<8x128xf32>
    %390 = vector.shape_cast %389 : vector<8x128xf32> to vector<1x8x128xf32>
    %cst_82 = arith.constant dense<0.000000e+00> : vector<1xf32>
    %391 = vector.multi_reduction <add>, %390, %cst_82 [1, 2] : vector<1x8x128xf32> to vector<1xf32>
    %392 = vector.shape_cast %391 : vector<1xf32> to vector<1x1x1xf32>
    %393 = vector.extract %392[0, 0, 0] : f32 from vector<1x1x1xf32>
    %394 = arith.mulf %389, %3 : vector<8x128xf32>
    %395 = vector.shape_cast %394 : vector<8x128xf32> to vector<1x8x128xf32>
    %cst_83 = arith.constant dense<0.000000e+00> : vector<1xf32>
    %396 = vector.multi_reduction <add>, %395, %cst_83 [1, 2] : vector<1x8x128xf32> to vector<1xf32>
    %397 = vector.shape_cast %396 : vector<1xf32> to vector<1x1x1xf32>
    %398 = vector.extract %397[0, 0, 0] : f32 from vector<1x1x1xf32>
    %399 = arith.mulf %389, %4 : vector<8x128xf32>
    %400 = vector.shape_cast %399 : vector<8x128xf32> to vector<1x8x128xf32>
    %cst_84 = arith.constant dense<0.000000e+00> : vector<1xf32>
    %401 = vector.multi_reduction <add>, %400, %cst_84 [1, 2] : vector<1x8x128xf32> to vector<1xf32>
    %402 = vector.shape_cast %401 : vector<1xf32> to vector<1x1x1xf32>
    %403 = vector.extract %402[0, 0, 0] : f32 from vector<1x1x1xf32>
    %c7_i32_85 = arith.constant 7 : i32
    %404 = vector.broadcast %c7_i32_85 : i32 to vector<8x128xi32>
    %405 = arith.cmpi eq, %125, %404 : vector<8x128xi32>
    %c0_i32_86 = arith.constant 0 : i32
    %406 = vector.broadcast %c0_i32_86 : i32 to vector<8x128xi32>
    %407 = arith.cmpi eq, %124, %406 : vector<8x128xi32>
    %408 = arith.andi %407, %405 : vector<8x128xi1>
    %c1_i32_87 = arith.constant 1 : i32
    %409 = vector.broadcast %c1_i32_87 : i32 to vector<8x128xi32>
    %410 = arith.cmpi eq, %124, %409 : vector<8x128xi32>
    %411 = arith.andi %410, %405 : vector<8x128xi1>
    %c2_i32_88 = arith.constant 2 : i32
    %412 = vector.broadcast %c2_i32_88 : i32 to vector<8x128xi32>
    %413 = arith.cmpi eq, %124, %412 : vector<8x128xi32>
    %414 = arith.andi %413, %405 : vector<8x128xi1>
    %cst_89 = arith.constant 0.000000e+00 : f32
    %415 = vector.broadcast %403 : f32 to vector<8x128xf32>
    %416 = vector.broadcast %cst_89 : f32 to vector<8x128xf32>
    %417 = arith.select %414, %415, %416 : vector<8x128xi1>, vector<8x128xf32>
    %418 = vector.broadcast %398 : f32 to vector<8x128xf32>
    %419 = arith.select %411, %418, %417 : vector<8x128xi1>, vector<8x128xf32>
    %420 = vector.broadcast %393 : f32 to vector<8x128xf32>
    %421 = arith.select %408, %420, %419 : vector<8x128xi1>, vector<8x128xf32>
    %422 = arith.addf %385, %421 : vector<8x128xf32>
    %c8_i32_90 = arith.constant 8 : i32
    %423 = vector.broadcast %c8_i32_90 : i32 to vector<8x128xi32>
    %424 = arith.cmpi eq, %123, %423 : vector<8x128xi32>
    %cst_91 = arith.constant 0.000000e+00 : f32
    %425 = vector.broadcast %cst_91 : f32 to vector<8x128xf32>
    %426 = arith.select %424, %5, %425 : vector<8x128xi1>, vector<8x128xf32>
    %427 = vector.shape_cast %426 : vector<8x128xf32> to vector<1x8x128xf32>
    %cst_92 = arith.constant dense<0.000000e+00> : vector<1xf32>
    %428 = vector.multi_reduction <add>, %427, %cst_92 [1, 2] : vector<1x8x128xf32> to vector<1xf32>
    %429 = vector.shape_cast %428 : vector<1xf32> to vector<1x1x1xf32>
    %430 = vector.extract %429[0, 0, 0] : f32 from vector<1x1x1xf32>
    %431 = arith.mulf %426, %3 : vector<8x128xf32>
    %432 = vector.shape_cast %431 : vector<8x128xf32> to vector<1x8x128xf32>
    %cst_93 = arith.constant dense<0.000000e+00> : vector<1xf32>
    %433 = vector.multi_reduction <add>, %432, %cst_93 [1, 2] : vector<1x8x128xf32> to vector<1xf32>
    %434 = vector.shape_cast %433 : vector<1xf32> to vector<1x1x1xf32>
    %435 = vector.extract %434[0, 0, 0] : f32 from vector<1x1x1xf32>
    %436 = arith.mulf %426, %4 : vector<8x128xf32>
    %437 = vector.shape_cast %436 : vector<8x128xf32> to vector<1x8x128xf32>
    %cst_94 = arith.constant dense<0.000000e+00> : vector<1xf32>
    %438 = vector.multi_reduction <add>, %437, %cst_94 [1, 2] : vector<1x8x128xf32> to vector<1xf32>
    %439 = vector.shape_cast %438 : vector<1xf32> to vector<1x1x1xf32>
    %440 = vector.extract %439[0, 0, 0] : f32 from vector<1x1x1xf32>
    %c8_i32_95 = arith.constant 8 : i32
    %441 = vector.broadcast %c8_i32_95 : i32 to vector<8x128xi32>
    %442 = arith.cmpi eq, %125, %441 : vector<8x128xi32>
    %c0_i32_96 = arith.constant 0 : i32
    %443 = vector.broadcast %c0_i32_96 : i32 to vector<8x128xi32>
    %444 = arith.cmpi eq, %124, %443 : vector<8x128xi32>
    %445 = arith.andi %444, %442 : vector<8x128xi1>
    %c1_i32_97 = arith.constant 1 : i32
    %446 = vector.broadcast %c1_i32_97 : i32 to vector<8x128xi32>
    %447 = arith.cmpi eq, %124, %446 : vector<8x128xi32>
    %448 = arith.andi %447, %442 : vector<8x128xi1>
    %c2_i32_98 = arith.constant 2 : i32
    %449 = vector.broadcast %c2_i32_98 : i32 to vector<8x128xi32>
    %450 = arith.cmpi eq, %124, %449 : vector<8x128xi32>
    %451 = arith.andi %450, %442 : vector<8x128xi1>
    %cst_99 = arith.constant 0.000000e+00 : f32
    %452 = vector.broadcast %440 : f32 to vector<8x128xf32>
    %453 = vector.broadcast %cst_99 : f32 to vector<8x128xf32>
    %454 = arith.select %451, %452, %453 : vector<8x128xi1>, vector<8x128xf32>
    %455 = vector.broadcast %435 : f32 to vector<8x128xf32>
    %456 = arith.select %448, %455, %454 : vector<8x128xi1>, vector<8x128xf32>
    %457 = vector.broadcast %430 : f32 to vector<8x128xf32>
    %458 = arith.select %445, %457, %456 : vector<8x128xi1>, vector<8x128xf32>
    %459 = arith.addf %422, %458 : vector<8x128xf32>
    %c0_100 = arith.constant 0 : index
    %c0_101 = arith.constant 0 : index
    %460 = vector.load %arg5[%c0_100, %c0_101] : memref<8x128xf32, #tpu.memory_space<vmem>>, vector<8x128xf32>
    %461 = arith.addf %460, %459 : vector<8x128xf32>
    %c0_102 = arith.constant 0 : index
    %c0_103 = arith.constant 0 : index
    %462 = vector.load %arg5[%c0_102, %c0_103] : memref<8x128xf32, #tpu.memory_space<vmem>>, vector<8x128xf32>
    tpu.vector_store %arg5[%c0_102, %c0_103], %461 {strides = array<i32>} : memref<8x128xf32, #tpu.memory_space<vmem>>, vector<8x128xf32>,
    return
  }
  func.func @transform_0(%arg0: i32) -> i32 {
    %c0_i32 = arith.constant 0 : i32
    %c0_i32_0 = arith.constant 0 : i32
    return %c0_i32 : i32
  }
  func.func @transform_1(%arg0: i32) -> (i32, i32) {
    %c0_i32 = arith.constant 0 : i32
    %c0_i32_0 = arith.constant 0 : i32
    return %arg0, %c0_i32 : i32, i32
  }
  func.func @transform_2(%arg0: i32) -> (i32, i32) {
    %c0_i32 = arith.constant 0 : i32
    %c0_i32_0 = arith.constant 0 : i32
    return %arg0, %c0_i32 : i32, i32
  }
  func.func @transform_3(%arg0: i32) -> (i32, i32) {
    %c0_i32 = arith.constant 0 : i32
    %c0_i32_0 = arith.constant 0 : i32
    return %arg0, %c0_i32 : i32, i32
  }
  func.func @transform_4(%arg0: i32) -> (i32, i32) {
    %c0_i32 = arith.constant 0 : i32
    %c0_i32_0 = arith.constant 0 : i32
    %c0_i32_1 = arith.constant 0 : i32
    return %c0_i32, %c0_i32_0 : i32, i32
  }
}

</mosaic_0001>

<bundles_post_ra>
// kernel: _kmeans_stats.1
= control target key start
LH: loop header
LB: loop body
LE: loop exit
PB: predicated region body
PF: predicated region fallthrough
CT: control target
= control target key end

     0   :  { %9 = vsyncpa [#allocation5], 0  ;;  %s1135_s0 = inlined_call_operand.hbm [shape: f32[18], index: 0, kind: input, shape index: {}]   ;;  %s1136_s1 = inlined_call_operand.hbm [shape: f32[8,128], index: 1, kind: input, shape index: {}]   ;;  %s1137_s2 = inlined_call_operand.hbm [shape: f32[8,128], index: 2, kind: input, shape index: {}]   ;;  %s1138_s3 = inlined_call_operand.hbm [shape: f32[8,128], index: 3, kind: input, shape index: {}]   ;;  %s1139_s4 = inlined_call_operand.hbm [shape: f32[8,128], index: 4, kind: output, shape index: {}]  }
   0x1   :  { %10 = vsyncpa [#allocation3], 0 }
   0x2   :  { %11 = vsyncpa [#allocation8], 0 }
   0x3   :  { %12 = vsyncpa [#allocation4], 0  ;;  %s757_s15 = smov [#allocation7]   ;;  %s758_s17 = smov [#allocation6]  }
   0x4   :  { %s37_s16 = sshll.u32 %s757_s15, 4  ;;  %s27_s18 = sshll.u32 %s758_s17, 4  ;;  %s38_s16 = int_to_ptr.vmem [resolvable:$true] %s37_s16  ;;  %s28_s18 = int_to_ptr.vmem [resolvable:$true] %s27_s18 }
   0x5   :  { %s669_s19 = scalar_lea.vmem %s38_s16, 128  ;;  %p674_p1 = scmp.lt.s32.totalorder %s38_s16, %s38_s16 }
   0x6   :  { %p670_p0 = scmp.ne.s32.totalorder %s38_s16, %s669_s19  ;;  %p675_p2 = scmp.lt.s32.totalorder %s669_s19, %s669_s19 }
   0x8   :  { %p676_p3 = por %p675_p2, %p674_p1 }
   0xa   :  { %p677_p4 = pnand %p676_p3, %p670_p0 }
   0xc   :  { %680 = shalt.err (!%p677_p4)
}
   0xd   :  { %40 = dma.hbm_to_vmem [thread:$0]  %s1137_s2, 128, %s38_s16, [#allocation8]  }
   0xe   :  { %s759_s22 = smov [#allocation2]   ;;  %s697_s25 = scalar_lea.vmem %s28_s18, 128 }
   0xf   :  { %20 = dma.hbm_to_smem %s1135_s0, 16, %s759_s22, [#allocation5]  }
  0x10   :  { %p698_p5 = scmp.ne.s32.totalorder %s28_s18, %s697_s25  ;;  %p702_p6 = scmp.lt.s32.totalorder %s28_s18, %s28_s18 }
  0x11   :  { %p703_p7 = scmp.lt.s32.totalorder %s697_s25, %s697_s25 }
  0x13   :  { %p704_p8 = por %p703_p7, %p702_p6 }
  0x15   :  { %p705_p9 = pnand %p704_p8, %p698_p5 }
  0x17   :  { %708 = shalt.err (!%p705_p9)
}
  0x18   :  { %30 = dma.hbm_to_vmem [thread:$0]  %s1136_s1, 128, %s28_s18, [#allocation3]  }
  0x19   :  { %s760_s28 = smov [#allocation9]  }
  0x1a   :  { %s47_s29 = sshll.u32 %s760_s28, 4  ;;  %s48_s29 = int_to_ptr.vmem [resolvable:$true] %s47_s29 }
  0x1b   :  { %s717_s2 = scalar_lea.vmem %s48_s29, 128  ;;  %p722_p11 = scmp.lt.s32.totalorder %s48_s29, %s48_s29 }
  0x1c   :  { %p718_p10 = scmp.ne.s32.totalorder %s48_s29, %s717_s2  ;;  %p723_p12 = scmp.lt.s32.totalorder %s717_s2, %s717_s2 }
  0x1e   :  { %p724_p13 = por %p723_p12, %p722_p11 }
  0x20   :  { %p725_p0 = pnand %p724_p13, %p718_p10 }
  0x22   :  { %728 = shalt.err (!%p725_p0)
}
  0x23   :  { %50 = dma.hbm_to_vmem [thread:$0]  %s1138_s3, 128, %s48_s29, [#allocation8]  }
  0x24   :  { %749 = dma.done.wait [#allocation5], 16  }
  0x25   :  { %750 = vsyncadd [#allocation5], 4294967280 }
  0x26   :  { %751 = dma.done.wait [#allocation3], 128  }
  0x27   :  { %752 = vsyncadd [#allocation3], 4294967168 }
  0x28   :  { %753 = dma.done.wait [#allocation8], 256  }
  0x29   :  { %754 = vsyncadd [#allocation8], 4294967040 }
  0x2a   :  { %63 = sfence }
  0x2b   :  { %s72_s1 = sld [smem:[#allocation2]]  ;;  %v800_v0 = vld [vmem:[#allocation6] sm:$0xff]  ;;  %v802_v1 = vld [vmem:[#allocation7] sm:$0xff]  ;;  %v761_v34 = vmov 0  }
  0x2c   :  { %s583_s5 = sld [smem:[#allocation2 + $0x9]] }
  0x2d   :  { %s584_s6 = sld [smem:[#allocation2 + $0x1]] }
  0x2e   :  { %s585_s7 = sld [smem:[#allocation2 + $0xa]] }
  0x2f   :  { %s586_s8 = sld [smem:[#allocation2 + $0x2]] }
  0x30   :  { %s587_s9 = sld [smem:[#allocation2 + $0xb]] }
  0x31   :  { %v73_v2 = vstv %s72_s1  ;;  %s588_s10 = sld [smem:[#allocation2 + $0x3]] }
  0x32   :  { %v74_v3 = vsub.f32 %v800_v0, %v73_v2  ;;  %v76_v4 = vstv %s583_s5  ;;  %s589_s3 = sld [smem:[#allocation2 + $0xc]] }
  0x33   :  { %v77_v5 = vsub.f32 %v802_v1, %v76_v4  ;;  %v84_v6 = vstv %s584_s6  ;;  %s806_s11 = sld [smem:[#allocation2 + $0x4]] }
  0x34   :  { %v78_v7 = vmul.f32 %v74_v3, %v74_v3  ;;  %v85_v8 = vsub.f32 %v800_v0, %v84_v6  ;;  %v87_v9 = vstv %s585_s7  ;;  %s809_s12 = sld [smem:[#allocation2 + $0xd]] }
  0x35   :  { %v79_v10 = vmul.f32 %v77_v5, %v77_v5  ;;  %v88_v11 = vsub.f32 %v802_v1, %v87_v9  ;;  %v96_v12 = vstv %s586_s8  ;;  %s812_s13 = sld [smem:[#allocation2 + $0x5]] }
  0x36   :  { %v89_v13 = vmul.f32 %v85_v8, %v85_v8  ;;  %v97_v14 = vsub.f32 %v800_v0, %v96_v12  ;;  %v99_v15 = vstv %s587_s9  ;;  %s815_s14 = sld [smem:[#allocation2 + $0xe]] }
  0x37   :  { %v80_v16 = vadd.f32 %v79_v10, %v78_v7  ;;  %v90_v17 = vmul.f32 %v88_v11, %v88_v11  ;;  %v100_v18 = vsub.f32 %v802_v1, %v99_v15  ;;  %v108_v19 = vstv %s588_s10  ;;  %s818_s15 = sld [smem:[#allocation2 + $0x6]] }
  0x38   :  { %v101_v20 = vmul.f32 %v97_v14, %v97_v14  ;;  %v109_v21 = vsub.f32 %v800_v0, %v108_v19  ;;  %v111_v22 = vstv %s589_s3  ;;  %s821_s16 = sld [smem:[#allocation2 + $0xf]]  ;;  %v71_v19 = vld [vmem:[#allocation9] sm:$0xff] }
  0x39   :  { %vm81_vm0 = vcmp.lt.f32.partialorder %v80_v16, inf  ;;  %v91_v23 = vadd.f32 %v90_v17, %v89_v13  ;;  %v102_v24 = vmul.f32 %v100_v18, %v100_v18  ;;  %v112_v25 = vsub.f32 %v802_v1, %v111_v22  ;;  %s824_s17 = sld [smem:[#allocation2 + $0x7]] }
  0x3a   :  { %v82_v26 = vsel %vm81_vm0, %v80_v16, inf  ;;  %v113_v27 = vmul.f32 %v109_v21, %v109_v21  ;;  %v120_v28 = vstv %s806_s11  ;;  %v123_v29 = vstv %s809_s12  ;;  %s828_s18 = sld [smem:[#allocation2 + $0x10]] }
  0x3b   :  { %vm92_vm1 = vcmp.lt.f32.partialorder %v91_v23, %v82_v26  ;;  %v103_v30 = vadd.f32 %v102_v24, %v101_v20  ;;  %v114_v31 = vmul.f32 %v112_v25, %v112_v25  ;;  %v121_v32 = vsub.f32 %v800_v0, %v120_v28  ;;  %s831_s19 = sld [smem:[#allocation2 + $0x8]] }
  0x3c   :  { %v93_v33 = vsel %vm92_vm1, %v91_v23, %v82_v26  ;;  %v94_v35 = vsel %vm92_vm1, 1, %v761_v34  ;;  %v124_v36 = vsub.f32 %v802_v1, %v123_v29  ;;  %v132_v37 = vstv %s812_s13  ;;  %s835_s20 = sld [smem:[#allocation2 + $0x11]] }
  0x3d   :  { %vm104_vm2 = vcmp.lt.f32.partialorder %v103_v30, %v93_v33  ;;  %v115_v38 = vadd.f32 %v114_v31, %v113_v27  ;;  %v125_v39 = vmul.f32 %v121_v32, %v121_v32  ;;  %v133_v40 = vsub.f32 %v800_v0, %v132_v37 }
  0x3e   :  { %v105_v41 = vsel %vm104_vm2, %v103_v30, %v93_v33  ;;  %v106_v42 = vsel %vm104_vm2, 2, %v94_v35  ;;  %v126_v43 = vmul.f32 %v124_v36, %v124_v36  ;;  %v135_v44 = vstv %s815_s14 }
  0x3f   :  { %vm116_vm3 = vcmp.lt.f32.partialorder %v115_v38, %v105_v41  ;;  %v136_v45 = vsub.f32 %v802_v1, %v135_v44  ;;  %v137_v46 = vmul.f32 %v133_v40, %v133_v40  ;;  %v144_v47 = vstv %s818_s15 }
  0x40   :  { %v117_v48 = vsel %vm116_vm3, %v115_v38, %v105_v41  ;;  %v118_v49 = vsel %vm116_vm3, 3, %v106_v42  ;;  %v127_v50 = vadd.f32 %v126_v43, %v125_v39  ;;  %v145_v51 = vsub.f32 %v800_v0, %v144_v47 }
  0x41   :  { %v138_v52 = vmul.f32 %v136_v45, %v136_v45  ;;  %v147_v53 = vstv %s821_s16  ;;  %v156_v54 = vstv %s824_s17  ;;  %v159_v55 = vstv %s828_s18  ;;  %s762_s18 = smov [#allocation10]  }
  0x42   :  { %vm128_vm4 = vcmp.lt.f32.partialorder %v127_v50, %v117_v48  ;;  %v148_v56 = vsub.f32 %v802_v1, %v147_v53  ;;  %v149_v57 = vmul.f32 %v145_v51, %v145_v51  ;;  %v157_v58 = vsub.f32 %v800_v0, %v156_v54 }
  0x43   :  { %v129_v59 = vsel %vm128_vm4, %v127_v50, %v117_v48  ;;  %v130_v60 = vsel %vm128_vm4, 4, %v118_v49  ;;  %v139_v61 = vadd.f32 %v138_v52, %v137_v46  ;;  %v160_v62 = vsub.f32 %v802_v1, %v159_v55 }
  0x44   :  { %v150_v63 = vmul.f32 %v148_v56, %v148_v56  ;;  %v161_v2 = vmul.f32 %v157_v58, %v157_v58  ;;  %v168_v3 = vstv %s831_s19  ;;  %v171_v4 = vstv %s835_s20  ;;  %s572_s19 = sshll.u32 %s762_s18, 4  ;;  %s573_s19 = int_to_ptr.vmem [resolvable:$true] %s572_s19 }
  0x45   :  { %vm140_vm5 = vcmp.lt.f32.partialorder %v139_v61, %v129_v59  ;;  %v162_v5 = vmul.f32 %v160_v62, %v160_v62  ;;  %v169_v6 = vsub.f32 %v800_v0, %v168_v3  ;;  %v172_v7 = vsub.f32 %v802_v1, %v171_v4  ;;  %s729_s20 = scalar_lea.vmem %s573_s19, 128  ;;  %p734_p2 = scmp.lt.s32.totalorder %s573_s19, %s573_s19 }
  0x46   :  { %v141_v8 = vsel %vm140_vm5, %v139_v61, %v129_v59  ;;  %v142_v9 = vsel %vm140_vm5, 5, %v130_v60  ;;  %v151_v10 = vadd.f32 %v150_v63, %v149_v57  ;;  %p730_p1 = scmp.ne.s32.totalorder %s573_s19, %s729_s20  ;;  %p735_p3 = scmp.lt.s32.totalorder %s729_s20, %s729_s20 }
  0x47   :  { %v163_v11 = vadd.f32 %v162_v5, %v161_v2  ;;  %v173_v12 = vmul.f32 %v169_v6, %v169_v6  ;;  %v174_v13 = vmul.f32 %v172_v7, %v172_v7 }
  0x48   :  { %vm152_vm6 = vcmp.lt.f32.partialorder %v151_v10, %v141_v8  ;;  %p736_p4 = por %p735_p3, %p734_p2 }
  0x49   :  { %v153_v14 = vsel %vm152_vm6, %v151_v10, %v141_v8  ;;  %v154_v15 = vsel %vm152_vm6, 6, %v142_v9  ;;  %v175_v16 = vadd.f32 %v174_v13, %v173_v12 }
  0x4a   :  { %vm164_vm7 = vcmp.lt.f32.partialorder %v163_v11, %v153_v14  ;;  %p737_p5 = pnand %p736_p4, %p730_p1 }
  0x4b   :  { %v165_v17 = vsel %vm164_vm7, %v163_v11, %v153_v14  ;;  %v166_v18 = vsel %vm164_vm7, 7, %v154_v15 }
  0x4c   :  { %vm176_vm8 = vcmp.lt.f32.partialorder %v175_v16, %v165_v17 }
  0x4d   :  { %v177_v20 = vsel %vm176_vm8, 8, %v166_v18 }
  0x4e   :  { %vm227_vm9 = vcmp.eq.s32.totalorder %v177_v20, 1  ;;  %vm182_vm10 = vcmp.eq.s32.totalorder %v177_v20, 0  ;;  %vm311_vm11 = vcmp.eq.s32.totalorder %v177_v20, 3  ;;  %vm269_vm12 = vcmp.eq.s32.totalorder %v177_v20, 2 }
  0x4f   :  { %v228_v21 = vsel %vm227_vm9, %v71_v19, 0.0  ;;  %v183_v22 = vsel %vm182_vm10, %v71_v19, 0.0  ;;  %v312_v23 = vsel %vm311_vm11, %v71_v19, 0.0  ;;  %v270_v24 = vsel %vm269_vm12, %v71_v19, 0.0 }
  0x50   :  { %229 = vadd.xlane.f32.xlu1 %v228_v21  ;;  %184 = vadd.xlane.f32.xlu0 %v183_v22  ;;  %vm395_vm13 = vcmp.eq.s32.totalorder %v177_v20, 5  ;;  %vm353_vm14 = vcmp.eq.s32.totalorder %v177_v20, 4  ;;  %v203_v27 = vmul.f32 %v183_v22, %v802_v1  ;;  %v193_v28 = vmul.f32 %v183_v22, %v800_v0 }
  0x51   :  { %v396_v25 = vsel %vm395_vm13, %v71_v19, 0.0  ;;  %v354_v26 = vsel %vm353_vm14, %v71_v19, 0.0  ;;  %v248_v29 = vmul.f32 %v228_v21, %v802_v1  ;;  %v238_v30 = vmul.f32 %v228_v21, %v800_v0 }
  0x52   :  { %v280_v31 = vmul.f32 %v270_v24, %v800_v0  ;;  %v290_v32 = vmul.f32 %v270_v24, %v802_v1  ;;  %v332_v33 = vmul.f32 %v312_v23, %v802_v1  ;;  %v322_v34 = vmul.f32 %v312_v23, %v800_v0 }
  0x53   :  { %v364_v35 = vmul.f32 %v354_v26, %v800_v0  ;;  %v374_v36 = vmul.f32 %v354_v26, %v802_v1  ;;  %vm437_vm15 = vcmp.eq.s32.totalorder %v177_v20, 6  ;;  %v416_v37 = vmul.f32 %v396_v25, %v802_v1 }
  0x54   :  { %313 = vadd.xlane.f32.xlu1 %v312_v23  ;;  %271 = vadd.xlane.f32.xlu0 %v270_v24  ;;  %v406_v38 = vmul.f32 %v396_v25, %v800_v0  ;;  %v438_v39 = vsel %vm437_vm15, %v71_v19, 0.0  ;;  %vm479_vm0 = vcmp.eq.s32.totalorder %v177_v20, 7  ;;  %vm521_vm1 = vcmp.eq.s32.totalorder %v177_v20, 8 }
  0x55   :  { %v448_v40 = vmul.f32 %v438_v39, %v800_v0  ;;  %v458_v41 = vmul.f32 %v438_v39, %v802_v1  ;;  %v480_v42 = vsel %vm479_vm0, %v71_v19, 0.0  ;;  %v522_v45 = vsel %vm521_vm1, %v71_v19, 0.0 }
  0x56   :  { %v500_v43 = vmul.f32 %v480_v42, %v802_v1  ;;  %v490_v44 = vmul.f32 %v480_v42, %v800_v0  ;;  %v532_v46 = vmul.f32 %v522_v45, %v800_v0  ;;  %v542_v47 = vmul.f32 %v522_v45, %v802_v1 }
  0x58   :  { %397 = vadd.xlane.f32.xlu1 %v396_v25  ;;  %355 = vadd.xlane.f32.xlu0 %v354_v26 }
  0x5c   :  { %204 = vadd.xlane.f32.xlu1 %v203_v27  ;;  %194 = vadd.xlane.f32.xlu0 %v193_v28 }
  0x60   :  { %249 = vadd.xlane.f32.xlu1 %v248_v29  ;;  %239 = vadd.xlane.f32.xlu0 %v238_v30 }
  0x64   :  { %281 = vadd.xlane.f32.xlu1 %v280_v31  ;;  %291 = vadd.xlane.f32.xlu0 %v290_v32 }
  0x68   :  { %333 = vadd.xlane.f32.xlu1 %v332_v33  ;;  %323 = vadd.xlane.f32.xlu0 %v322_v34 }
  0x6c   :  { %365 = vadd.xlane.f32.xlu1 %v364_v35  ;;  %375 = vadd.xlane.f32.xlu0 %v374_v36 }
  0x70   :  { %417 = vadd.xlane.f32.xlu1 %v416_v37  ;;  %407 = vadd.xlane.f32.xlu0 %v406_v38 }
  0x74   :  { %449 = vadd.xlane.f32.xlu1 %v448_v40  ;;  %439 = vadd.xlane.f32.xlu0 %v438_v39 }
  0x78   :  { %481 = vadd.xlane.f32.xlu1 %v480_v42  ;;  %459 = vadd.xlane.f32.xlu0 %v458_v41 }
  0x7c   :  { %501 = vadd.xlane.f32.xlu1 %v500_v43  ;;  %491 = vadd.xlane.f32.xlu0 %v490_v44 }
  0x80   :  { %533 = vadd.xlane.f32.xlu1 %v532_v46  ;;  %523 = vadd.xlane.f32.xlu0 %v522_v45 }
  0x84   :  { %543 = vadd.xlane.f32.xlu0 %v542_v47 }
  0xd9   :  { %v230_v48 = vpop.xlane.xlu1 %229  ;;  %v185_v49 = vpop.xlane.xlu0 %184 }
  0xda   :  { %v186_v50 = vrot.slane %v185_v49, 4  ;;  %v231_v52 = vrot.slane %v230_v48, 4 }
  0xdc   :  { %v187_v51 = vadd.f32 %v186_v50, %v185_v49  ;;  %v232_v57 = vadd.f32 %v231_v52, %v230_v48 }
  0xdd   :  { %v314_v53 = vpop.xlane.xlu1 %313  ;;  %v272_v54 = vpop.xlane.xlu0 %271 }
  0xde   :  { %v188_v55 = vrot.slane %v187_v51, 2  ;;  %v273_v60 = vrot.slane %v272_v54, 4  ;;  %v233_v0 = vrot.slane %v232_v57, 2  ;;  %v315_v62 = vrot.slane %v314_v53, 4 }
  0xe0   :  { %v189_v56 = vadd.f32 %v188_v55, %v187_v51  ;;  %v274_v5 = vadd.f32 %v273_v60, %v272_v54  ;;  %v316_v8 = vadd.f32 %v315_v62, %v314_v53  ;;  %v234_v12 = vadd.f32 %v233_v0, %v232_v57 }
  0xe1   :  { %v398_v58 = vpop.xlane.xlu1 %397  ;;  %v356_v59 = vpop.xlane.xlu0 %355 }
  0xe2   :  { %v190_v61 = vrot.slane %v189_v56, 1  ;;  %v399_v9 = vrot.slane %v398_v58, 4  ;;  %v275_v17 = vrot.slane %v274_v5, 2  ;;  %v357_v18 = vrot.slane %v356_v59, 4 }
  0xe3   :  { %v317_v23 = vrot.slane %v316_v8, 2  ;;  %v235_v27 = vrot.slane %v234_v12, 1 }
  0xe4   :  { %v191_v1 = vadd.f32 %v190_v61, %v189_v56  ;;  %v400_v24 = vadd.f32 %v399_v9, %v398_v58  ;;  %v358_v32 = vadd.f32 %v357_v18, %v356_v59  ;;  %v276_v35 = vadd.f32 %v275_v17, %v274_v5 }
  0xe5   :  { %v205_v63 = vpop.xlane.xlu1 %204  ;;  %v195_v2 = vpop.xlane.xlu0 %194  ;;  %v236_v44 = vadd.f32 %v235_v27, %v234_v12  ;;  %v318_v45 = vadd.f32 %v317_v23, %v316_v8 }
  0xe6   :  { %v206_v3 = vrot.slane %v205_v63, 4  ;;  %v196_v4 = vrot.slane %v195_v2, 4  ;;  %600 = vpush %v191_v1  ;;  %v359_v50 = vrot.slane %v358_v32, 2  ;;  %v277_v53 = vrot.slane %v276_v35, 1 }
  0xe7   :  { %v401_v58 = vrot.slane %v400_v24, 2  ;;  %v319_v62 = vrot.slane %v318_v45, 1 }
  0xe8   :  { %v207_v6 = vadd.f32 %v206_v3, %v205_v63  ;;  %v197_v7 = vadd.f32 %v196_v4, %v195_v2  ;;  %v278_v4 = vadd.f32 %v277_v53, %v276_v35 }
  0xe9   :  { %v250_v10 = vpop.xlane.xlu1 %249  ;;  %v240_v11 = vpop.xlane.xlu0 %239 }
  0xea   :  { %v208_v13 = vrot.slane %v207_v6, 2  ;;  %v198_v14 = vrot.slane %v197_v7, 2  ;;  %v251_v15 = vrot.slane %v250_v10, 4  ;;  %v241_v16 = vrot.slane %v240_v11, 4 }
  0xec   :  { %v252_v19 = vadd.f32 %v251_v15, %v250_v10  ;;  %v242_v20 = vadd.f32 %v241_v16, %v240_v11  ;;  %v199_v21 = vadd.f32 %v198_v14, %v197_v7  ;;  %v209_v22 = vadd.f32 %v208_v13, %v207_v6 }
  0xed   :  { %v282_v25 = vpop.xlane.xlu1 %281  ;;  %v292_v26 = vpop.xlane.xlu0 %291  ;;  %v360_v7 = vadd.f32 %v359_v50, %v358_v32  ;;  %v402_v16 = vadd.f32 %v401_v58, %v400_v24 }
  0xee   :  { %v253_v28 = vrot.slane %v252_v19, 2  ;;  %v243_v29 = vrot.slane %v242_v20, 2  ;;  %v283_v30 = vrot.slane %v282_v25, 4  ;;  %v293_v31 = vrot.slane %v292_v26, 4 }
  0xef   :  { %v200_v33 = vrot.slane %v199_v21, 1  ;;  %v210_v34 = vrot.slane %v209_v22, 1 }
  0xf0   :  { %v284_v36 = vadd.f32 %v283_v30, %v282_v25  ;;  %v294_v37 = vadd.f32 %v293_v31, %v292_v26  ;;  %v244_v38 = vadd.f32 %v243_v29, %v242_v20  ;;  %v254_v39 = vadd.f32 %v253_v28, %v252_v19 }
  0xf1   :  { %v334_v40 = vpop.xlane.xlu1 %333  ;;  %v324_v41 = vpop.xlane.xlu0 %323  ;;  %v201_v42 = vadd.f32 %v200_v33, %v199_v21  ;;  %v211_v43 = vadd.f32 %v210_v34, %v209_v22  ;;  %v320_v21 = vadd.f32 %v319_v62, %v318_v45  ;;  %v361_v25 = vrot.slane %v360_v7, 1 }
  0xf2   :  { %v285_v46 = vrot.slane %v284_v36, 2  ;;  %v295_v47 = vrot.slane %v294_v37, 2  ;;  %v335_v48 = vrot.slane %v334_v40, 4  ;;  %v325_v49 = vrot.slane %v324_v41, 4 }
  0xf3   :  { %602 = vpush %v201_v42  ;;  %v245_v51 = vrot.slane %v244_v38, 1  ;;  %v255_v52 = vrot.slane %v254_v39, 1 }
  0xf4   :  { %v336_v54 = vadd.f32 %v335_v48, %v334_v40  ;;  %v326_v55 = vadd.f32 %v325_v49, %v324_v41  ;;  %604 = vpush %v211_v43  ;;  %v286_v56 = vadd.f32 %v285_v46, %v284_v36  ;;  %v296_v57 = vadd.f32 %v295_v47, %v294_v37 }
  0xf5   :  { %606 = vpush %v236_v44  ;;  %v366_v59 = vpop.xlane.xlu1 %365  ;;  %v376_v60 = vpop.xlane.xlu0 %375  ;;  %v246_v61 = vadd.f32 %v245_v51, %v244_v38  ;;  %v256_v0 = vadd.f32 %v255_v52, %v254_v39  ;;  %v362_v37 = vadd.f32 %v361_v25, %v360_v7  ;;  %v403_v40 = vrot.slane %v402_v16, 1 }
  0xf6   :  { %v337_v63 = vrot.slane %v336_v54, 2  ;;  %v327_v2 = vrot.slane %v326_v55, 2  ;;  %v367_v1 = vrot.slane %v366_v59, 4  ;;  %v377_v3 = vrot.slane %v376_v60, 4 }
  0xf7   :  { %608 = vpush %v246_v61  ;;  %v287_v5 = vrot.slane %v286_v56, 1  ;;  %v297_v6 = vrot.slane %v296_v57, 1  ;;  %v404_v53 = vadd.f32 %v403_v40, %v402_v16 }
  0xf8   :  { %v368_v8 = vadd.f32 %v367_v1, %v366_v59  ;;  %v378_v9 = vadd.f32 %v377_v3, %v376_v60  ;;  %610 = vpush %v256_v0  ;;  %v328_v10 = vadd.f32 %v327_v2, %v326_v55  ;;  %v338_v11 = vadd.f32 %v337_v63, %v336_v54 }
  0xf9   :  { %612 = vpush %v278_v4  ;;  %v418_v12 = vpop.xlane.xlu1 %417  ;;  %v408_v13 = vpop.xlane.xlu0 %407  ;;  %v288_v14 = vadd.f32 %v287_v5, %v286_v56  ;;  %v298_v15 = vadd.f32 %v297_v6, %v296_v57 }
  0xfa   :  { %v369_v17 = vrot.slane %v368_v8, 2  ;;  %v379_v18 = vrot.slane %v378_v9, 2  ;;  %v419_v19 = vrot.slane %v418_v12, 4  ;;  %v409_v20 = vrot.slane %v408_v13, 4 }
  0xfb   :  { %614 = vpush %v288_v14  ;;  %v329_v22 = vrot.slane %v328_v10, 1  ;;  %v339_v23 = vrot.slane %v338_v11, 1 }
  0xfc   :  { %v420_v26 = vadd.f32 %v419_v19, %v418_v12  ;;  %v410_v27 = vadd.f32 %v409_v20, %v408_v13  ;;  %616 = vpush %v298_v15  ;;  %v370_v28 = vadd.f32 %v369_v17, %v368_v8  ;;  %v380_v29 = vadd.f32 %v379_v18, %v378_v9 }
  0xfd   :  { %618 = vpush %v320_v21  ;;  %v450_v30 = vpop.xlane.xlu1 %449  ;;  %v440_v31 = vpop.xlane.xlu0 %439  ;;  %v330_v32 = vadd.f32 %v329_v22, %v328_v10  ;;  %v340_v33 = vadd.f32 %v339_v23, %v338_v11 }
  0xfe   :  { %v421_v24 = vrot.slane %v420_v26, 2  ;;  %v411_v34 = vrot.slane %v410_v27, 2  ;;  %v451_v35 = vrot.slane %v450_v30, 4  ;;  %v441_v36 = vrot.slane %v440_v31, 4 }
  0xff   :  { %620 = vpush %v330_v32  ;;  %v371_v38 = vrot.slane %v370_v28, 1  ;;  %v381_v39 = vrot.slane %v380_v29, 1 }
 0x100   :  { %v452_v41 = vadd.f32 %v451_v35, %v450_v30  ;;  %v442_v42 = vadd.f32 %v441_v36, %v440_v31  ;;  %622 = vpush %v340_v33  ;;  %v412_v43 = vadd.f32 %v411_v34, %v410_v27  ;;  %v422_v44 = vadd.f32 %v421_v24, %v420_v26 }
 0x101   :  { %624 = vpush %v362_v37  ;;  %v482_v45 = vpop.xlane.xlu1 %481  ;;  %v460_v46 = vpop.xlane.xlu0 %459  ;;  %v372_v47 = vadd.f32 %v371_v38, %v370_v28  ;;  %v382_v48 = vadd.f32 %v381_v39, %v380_v29 }
 0x102   :  { %v453_v49 = vrot.slane %v452_v41, 2  ;;  %v443_v50 = vrot.slane %v442_v42, 2  ;;  %v483_v51 = vrot.slane %v482_v45, 4  ;;  %v461_v52 = vrot.slane %v460_v46, 4 }
 0x103   :  { %626 = vpush %v372_v47  ;;  %v413_v54 = vrot.slane %v412_v43, 1  ;;  %v423_v55 = vrot.slane %v422_v44, 1 }
 0x104   :  { %v484_v56 = vadd.f32 %v483_v51, %v482_v45  ;;  %v462_v57 = vadd.f32 %v461_v52, %v460_v46  ;;  %628 = vpush %v382_v48  ;;  %v444_v58 = vadd.f32 %v443_v50, %v442_v42  ;;  %v454_v59 = vadd.f32 %v453_v49, %v452_v41 }
 0x105   :  { %630 = vpush %v404_v53  ;;  %v502_v60 = vpop.xlane.xlu1 %501  ;;  %v492_v61 = vpop.xlane.xlu0 %491  ;;  %v414_v0 = vadd.f32 %v413_v54, %v412_v43  ;;  %v424_v62 = vadd.f32 %v423_v55, %v422_v44  ;;  %v178_v45 = vlaneseq }
 0x106   :  { %v485_v63 = vrot.slane %v484_v56, 2  ;;  %v463_v2 = vrot.slane %v462_v57, 2  ;;  %v503_v1 = vrot.slane %v502_v60, 4  ;;  %v493_v3 = vrot.slane %v492_v61, 4 }
 0x107   :  { %632 = vpush %v414_v0  ;;  %v445_v4 = vrot.slane %v444_v58, 1  ;;  %v455_v5 = vrot.slane %v454_v59, 1  ;;  %v882_v46 = vshrl.u32 %v178_v45, 7  ;;  %v884_v47 = vand.u32 127, %v178_v45 }
 0x108   :  { %v504_v6 = vadd.f32 %v503_v1, %v502_v60  ;;  %v494_v7 = vadd.f32 %v493_v3, %v492_v61  ;;  %634 = vpush %v424_v62  ;;  %v464_v8 = vadd.f32 %v463_v2, %v462_v57  ;;  %v486_v9 = vadd.f32 %v485_v63, %v484_v56 }
 0x109   :  { %v534_v10 = vpop.xlane.xlu1 %533  ;;  %v524_v11 = vpop.xlane.xlu0 %523  ;;  %v446_v12 = vadd.f32 %v445_v4, %v444_v58  ;;  %v456_v13 = vadd.f32 %v455_v5, %v454_v59  ;;  %vm213_vm2 = vcmp.eq.s32.totalorder %v884_v47, 0  ;;  %vm216_vm3 = vcmp.eq.s32.totalorder %v882_v46, 1 }
 0x10a   :  { %v505_v14 = vrot.slane %v504_v6, 2  ;;  %v495_v15 = vrot.slane %v494_v7, 2  ;;  %v535_v16 = vrot.slane %v534_v10, 4  ;;  %v525_v17 = vrot.slane %v524_v11, 4  ;;  %vm907_vm7 = vmand %vm216_vm3, %vm213_vm2 }
 0x10b   :  { %636 = vpush %v446_v12  ;;  %v465_v18 = vrot.slane %v464_v8, 1  ;;  %v487_v19 = vrot.slane %v486_v9, 1  ;;  %vm218_vm4 = vcmp.eq.s32.totalorder %v882_v46, 2  ;;  %vm258_vm5 = vcmp.eq.s32.totalorder %v884_v47, 1 }
 0x10c   :  { %v536_v20 = vadd.f32 %v535_v16, %v534_v10  ;;  %v526_v21 = vadd.f32 %v525_v17, %v524_v11  ;;  %638 = vpush %v456_v13  ;;  %v496_v22 = vadd.f32 %v495_v15, %v494_v7  ;;  %v506_v23 = vadd.f32 %v505_v14, %v504_v6  ;;  %vm915_vm8 = vmand %vm218_vm4, %vm213_vm2 }
 0x10d   :  { %v544_v25 = vpop.xlane.xlu0 %543  ;;  %v466_v26 = vadd.f32 %v465_v18, %v464_v8  ;;  %v488_v27 = vadd.f32 %v487_v19, %v486_v9  ;;  %vm214_vm6 = vcmp.eq.s32.totalorder %v882_v46, 0  ;;  %vm929_vm10 = vmand %vm216_vm3, %vm258_vm5  ;;  %vm300_vm11 = vcmp.eq.s32.totalorder %v884_v47, 2 }
 0x10e   :  { %v537_v28 = vrot.slane %v536_v20, 2  ;;  %v527_v29 = vrot.slane %v526_v21, 2  ;;  %v545_v30 = vrot.slane %v544_v25, 4  ;;  %v497_v31 = vrot.slane %v496_v22, 1  ;;  %vm923_vm9 = vmand %vm214_vm6, %vm258_vm5 }
 0x10f   :  { %640 = vpush %v466_v26  ;;  %v507_v32 = vrot.slane %v506_v23, 1  ;;  %vm940_vm12 = vmand %vm214_vm6, %vm213_vm2  ;;  %vm342_vm0 = vcmp.eq.s32.totalorder %v884_v47, 3 }
 0x110   :  { %v538_v33 = vadd.f32 %v537_v28, %v536_v20  ;;  %v546_v24 = vadd.f32 %v545_v30, %v544_v25  ;;  %642 = vpush %v488_v27  ;;  %v498_v34 = vadd.f32 %v497_v31, %v496_v22  ;;  %v528_v35 = vadd.f32 %v527_v29, %v526_v21  ;;  %vm261_vm13 = vmand %vm218_vm4, %vm258_vm5 }
 0x111   :  { %v508_v36 = vadd.f32 %v507_v32, %v506_v23  ;;  %vm949_vm14 = vmand %vm214_vm6, %vm300_vm11  ;;  %vm384_vm5 = vcmp.eq.s32.totalorder %v884_v47, 4 }
 0x112   :  { %v547_v37 = vrot.slane %v546_v24, 2  ;;  %644 = vpush %v498_v34  ;;  %v529_v38 = vrot.slane %v528_v35, 1  ;;  %v539_v39 = vrot.slane %v538_v33, 1  ;;  %vm958_vm15 = vmand %vm216_vm3, %vm300_vm11 }
 0x113   :  { %646 = vpush %v508_v36  ;;  %vm303_vm1 = vmand %vm218_vm4, %vm300_vm11 }
 0x114   :  { %v548_v40 = vadd.f32 %v547_v37, %v546_v24  ;;  %v530_v41 = vadd.f32 %v529_v38, %v528_v35  ;;  %v540_v42 = vadd.f32 %v539_v39, %v538_v33  ;;  %vm973_vm2 = vmand %vm214_vm6, %vm342_vm0 }
 0x115   :  { %vm345_vm11 = vmand %vm218_vm4, %vm342_vm0 }
 0x116   :  { %648 = vpush %v530_v41  ;;  %v549_v43 = vrot.slane %v548_v40, 1 }
 0x117   :  { %650 = vpush %v540_v42  ;;  %s870_s21 = spop %600 }
 0x118   :  { %v550_v44 = vadd.f32 %v549_v43, %v548_v40  ;;  %v224_v14 = vstv %s870_s21 }
 0x11a   :  { %652 = vpush %v550_v44 }
 0x124   :  { %s872_s22 = spop %602 }
 0x125   :  { %s874_s23 = spop %604  ;;  %v222_v61 = vstv %s872_s22 }
 0x126   :  { %s876_s24 = spop %606  ;;  %v220_v55 = vstv %s874_s23 }
 0x127   :  { %v221_v0 = vsel %vm915_vm8, %v220_v55, 0.0  ;;  %vm426_vm8 = vcmp.eq.s32.totalorder %v884_v47, 5  ;;  %v266_v10 = vstv %s876_s24 }
 0x128   :  { %s878_s25 = spop %608  ;;  %v223_v6 = vsel %vm907_vm7, %v222_v61, %v221_v0  ;;  %vm1030_vm7 = vmand %vm218_vm4, %vm426_vm8 }
 0x129   :  { %s880_s26 = spop %610  ;;  %v264_v58 = vstv %s878_s25  ;;  %v225_v19 = vsel %vm940_vm12, %v224_v14, %v223_v6  ;;  %vm1067_vm12 = vmand %vm216_vm3, %vm426_vm8 }
 0x12a   :  { %s886_s27 = spop %612  ;;  %v262_v53 = vstv %s880_s26 }
 0x12b   :  { %v263_v59 = vsel %vm261_vm13, %v262_v53, 0.0  ;;  %vm993_vm13 = vmand %vm216_vm3, %vm342_vm0  ;;  %vm468_vm0 = vcmp.eq.s32.totalorder %v884_v47, 6  ;;  %v308_v20 = vstv %s886_s27 }
 0x12c   :  { %s888_s28 = spop %614  ;;  %v265_v3 = vsel %vm929_vm10, %v264_v58, %v263_v59  ;;  %vm1016_vm10 = vmand %vm214_vm6, %vm384_vm5 }
 0x12d   :  { %s890_s29 = spop %616  ;;  %v306_v63 = vstv %s888_s28  ;;  %v267_v15 = vsel %vm923_vm9, %v266_v10, %v265_v3  ;;  %vm471_vm9 = vmand %vm218_vm4, %vm468_vm0 }
 0x12e   :  { %s894_s2 = spop %618  ;;  %v304_v57 = vstv %s890_s29  ;;  %v268_v28 = vadd.f32 %v267_v15, %v225_v19 }
 0x12f   :  { %v305_v2 = vsel %vm303_vm1, %v304_v57, 0.0  ;;  %vm1004_vm1 = vmand %vm218_vm4, %vm384_vm5  ;;  %v350_v29 = vstv %s894_s2 }
 0x130   :  { %s897_s0 = spop %620  ;;  %v307_v11 = vsel %vm958_vm15, %v306_v63, %v305_v2  ;;  %vm1042_vm15 = vmand %vm216_vm3, %vm384_vm5  ;;  %vm510_vm5 = vcmp.eq.s32.totalorder %v884_v47, 7 }
 0x131   :  { %s900_s30 = spop %622  ;;  %v348_v7 = vstv %s897_s0  ;;  %v309_v22 = vsel %vm949_vm14, %v308_v20, %v307_v11  ;;  %vm1080_vm14 = vmand %vm216_vm3, %vm468_vm0 }
 0x132   :  { %s919_s1 = spop %624  ;;  %v346_v62 = vstv %s900_s30  ;;  %v310_v24 = vadd.f32 %v309_v22, %v268_v28 }
 0x133   :  { %v347_v8 = vsel %vm345_vm11, %v346_v62, 0.0  ;;  %vm513_vm11 = vmand %vm218_vm4, %vm510_vm5  ;;  %v392_v34 = vstv %s919_s1 }
 0x134   :  { %s934_s5 = spop %626  ;;  %v349_v21 = vsel %vm993_vm13, %v348_v7, %v347_v8  ;;  %vm427_vm13 = vmand %vm214_vm6, %vm426_vm8 }
 0x135   :  { %s953_s6 = spop %628  ;;  %v390_v16 = vstv %s934_s5  ;;  %v351_v32 = vsel %vm973_vm2, %v350_v29, %v349_v21  ;;  %vm512_vm2 = vmand %vm216_vm3, %vm510_vm5 }
 0x136   :  { %s966_s7 = spop %630  ;;  %v388_v5 = vstv %s953_s6  ;;  %v352_v40 = vadd.f32 %v351_v32, %v310_v24  ;;  %vm469_vm8 = vmand %vm214_vm6, %vm468_vm0 }
 0x137   :  { %v389_v18 = vsel %vm1004_vm1, %v388_v5, 0.0  ;;  %v434_v41 = vstv %s966_s7  ;;  %vm552_vm1 = vcmp.eq.s32.totalorder %v884_v47, 8 }
 0x138   :  { %s978_s8 = spop %632  ;;  %v391_v30 = vsel %vm1042_vm15, %v390_v16, %v389_v18  ;;  %vm555_vm0 = vmand %vm218_vm4, %vm552_vm1 }
 0x139   :  { %s635_s9 = spop %634  ;;  %v432_v23 = vstv %s978_s8  ;;  %v393_v36 = vsel %vm1016_vm10, %v392_v34, %v391_v30  ;;  %vm511_vm10 = vmand %vm214_vm6, %vm510_vm5 }
 0x13a   :  { %v430_v13 = vstv %s635_s9  ;;  %v394_v45 = vadd.f32 %v393_v36, %v352_v40  ;;  %vm553_vm15 = vmand %vm214_vm6, %vm552_vm1 }
 0x13b   :  { %v431_v26 = vsel %vm1030_vm7, %v430_v13, 0.0  ;;  %vm554_vm7 = vmand %vm216_vm3, %vm552_vm1 }
 0x13c   :  { %s1020_s10 = spop %636  ;;  %v433_v35 = vsel %vm1067_vm12, %v432_v23, %v431_v26 }
 0x13d   :  { %s1048_s3 = spop %638  ;;  %v435_v44 = vsel %vm427_vm13, %v434_v41, %v433_v35  ;;  %v476_v48 = vstv %s1020_s10 }
 0x13e   :  { %v474_v37 = vstv %s1048_s3  ;;  %v436_v51 = vadd.f32 %v435_v44, %v394_v45 }
 0x140   :  { %s641_s11 = spop %640 }
 0x141   :  { %v472_v27 = vstv %s641_s11  ;;  %s1084_s12 = spop %642 }
 0x142   :  { %v473_v33 = vsel %vm471_vm9, %v472_v27, 0.0  ;;  %v518_v52 = vstv %s1084_s12 }
 0x143   :  { %s645_s13 = spop %644  ;;  %v475_v42 = vsel %vm1080_vm14, %v474_v37, %v473_v33 }
 0x144   :  { %s647_s14 = spop %646  ;;  %v516_v38 = vstv %s645_s13  ;;  %v477_v50 = vsel %vm469_vm8, %v476_v48, %v475_v42 }
 0x145   :  { %v514_v39 = vstv %s647_s14  ;;  %v478_v54 = vadd.f32 %v477_v50, %v436_v51 }
 0x146   :  { %v515_v43 = vsel %vm513_vm11, %v514_v39, 0.0 }
 0x147   :  { %v517_v49 = vsel %vm512_vm2, %v516_v38, %v515_v43  ;;  %s649_s15 = spop %648 }
 0x148   :  { %s651_s16 = spop %650  ;;  %v519_v53 = vsel %vm511_vm10, %v518_v52, %v517_v49  ;;  %v560_v59 = vstv %s649_s15 }
 0x149   :  { %v558_v56 = vstv %s651_s16  ;;  %v520_v58 = vadd.f32 %v519_v53, %v478_v54 }
 0x14b   :  { %s653_s17 = spop %652 }
 0x14c   :  { %v556_v55 = vstv %s653_s17 }
 0x14d   :  { %v557_v57 = vsel %vm555_vm0, %v556_v55, 0.0 }
 0x14e   :  { %v559_v60 = vsel %vm554_vm7, %v558_v56, %v557_v57 }
 0x14f   :  { %v561_v61 = vsel %vm553_vm15, %v560_v59, %v559_v60 }
 0x150   :  { %v562_v0 = vadd.f32 %v561_v61, %v520_v58 }
 0x152   :  { %565 = vst [vmem:[#allocation10] sm:$0xff] %v562_v0 }
 0x153   :  { %740 = shalt.err (!%p737_p5)
}
 0x154   :  { %575 = dma.vmem_to_hbm [thread:$0]  %s573_s19, 128, %s1139_s4, [#allocation4]  }
 0x155   :  { %755 = dma.done.wait [#allocation4], 128  }
 0x156   :  { %756 = vsyncadd [#allocation4], 4294967168 }
 0x157   :  { %579 = vsyncpa [#allocation3], 1 }
 0x158   :  { %580 = vsyncpa [#allocation8], 1 }
 0x159   :  { %581 = vsyncpa [#allocation4], 1 }
 0x15a   :  { %582 = vsyncpa [#allocation5], 1 }

</bundles_post_ra>
